<compile_context>
chip_gen: v6e
topology: v6e:2x2x1
jax: 0.10.0
libtpu: 0.0.40
codegen_flags: <defaults>
</compile_context>

<pallas_src>
import numpy as np
import jax
import jax.numpy as jnp
from jax import lax
from jax.experimental import pallas as pl
from jax.experimental.pallas import tpu as pltpu


def _pick_batch_tile(B):
    """Largest divisor of B that still leaves >= 2 grid steps (v7x: 2 TCs)."""
    if B <= 1:
        return 1
    for t in range(B // 2, 0, -1):
        if B % t == 0:
            return t
    return 1


def _make_fused_kernel(W, C_out, n_br, kmax, pad, hw, tile_b):
    nC = n_br * C_out
    L = tile_b * hw
    eps = 1e-5
    # Static per-tap lane shifts.  Tap (dy, dx) reads the input at flat offset
    # d = (dy - pad)*W + (dx - pad); roll(x, s)[p] == x[p - s], so s = (-d) % L.
    shifts = [(-((dy - pad) * W + (dx - pad))) % L
              for dy in range(kmax) for dx in range(kmax)]

    def kernel(x_ref, weff_ref, mask_ref, bmap_ref, gnw_ref, gnb_ref,
               mavg_ref, o_ref):
        # ---- concatenate the TILE_B images on the lane axis (hw-aligned) ----
        if tile_b > 1:
            xw = jnp.concatenate([x_ref[b] for b in range(tile_b)], axis=1)
        else:
            xw = x_ref[0]                                      # (C_in, L) f32

        # ---- im2col via XLU lane rotations (no misaligned slices / hpad) ----
        pieces = [xw if s == 0 else pltpu.roll(xw, shift=s, axis=1)
                  for s in shifts]
        xcol = jnp.concatenate(pieces, axis=0)                 # (K, L) f32
        # One f32 VPU pass zeroes every out-of-image tap (horizontal wrap,
        # vertical wrap and cross-image bleed of the circular rolls); a single
        # cast then feeds the MXU its native bf16 (no bf16 elementwise: v5e).
        xcol = (xcol * mask_ref[...]).astype(jnp.bfloat16)

        # ---- one fused bf16 MXU matmul: conv1 folded into both grouped ----
        # ---- inception branches (block-diagonal weights encode groups)  ----
        conv = jnp.dot(weff_ref[...], xcol,
                       preferred_element_type=jnp.float32)     # (nC, L) f32

        mavg = mavg_ref[...]
        gnw = gnw_ref[...]
        gnb = gnb_ref[...]
        bmap = bmap_ref[...]

        # ---- per-image GroupNorm (biased var, eps=1e-5) + LeakyReLU + sum ----
        for b in range(tile_b):
            cb = conv[:, b * hw:(b + 1) * hw] + bmap           # (nC, hw) f32
            # Lane sums first, then tiny (nC,nC)@(nC,1) group averages; this
            # replaces the f32 (nC,nC)@(nC,hw) MXU matmuls of the old scheme.
            s1 = jnp.sum(cb, axis=1, keepdims=True)            # (nC, 1)
            mean = jnp.dot(mavg, s1, preferred_element_type=jnp.float32)
            cent = cb - mean
            s2 = jnp.sum(cent * cent, axis=1, keepdims=True)   # biased var
            var = jnp.dot(mavg, s2, preferred_element_type=jnp.float32)
            y = cent * lax.rsqrt(var + eps) * gnw + gnb
            y = jnp.where(y >= 0.0, y, 0.2 * y)                # LeakyReLU(0.2)
            acc = y[0:C_out, :]
            for br in range(1, n_br):
                acc = acc + y[br * C_out:(br + 1) * C_out, :]
            o_ref[b] = acc.astype(o_ref.dtype)                 # lane-dense

    return kernel


def ginception_st_forward(x_nchw, params, *, incep_ker=(3, 5), groups=8,
                          batch_tile=None):
    B, C_in, H, W = x_nchw.shape
    w1 = params["conv1_w"].astype(jnp.float32)     # (C_hid, C_in), torch (O,I)
    b1 = params["conv1_b"].astype(jnp.float32)     # (C_hid,)
    C_hid = w1.shape[0]
    C_out = params["branches"][0]["b"].shape[0]
    n_br = len(incep_ker)
    kmax = max(incep_ker)
    pad = kmax // 2
    hw = H * W
    assert hw % 128 == 0, "flattened spatial extent must be lane-aligned"
    # mirrors the module: GroupConv2d falls back to groups=1 when C_hid%groups
    # != 0; callers must pass the adjusted value returned by init_params.
    assert C_hid % groups == 0 and C_out % groups == 0
    cin_g, cout_g = C_hid // groups, C_out // groups
    cpg = C_out // groups
    nC = n_br * C_out
    K = kmax * kmax * C_in

    if batch_tile is None:
        batch_tile = _pick_batch_tile(B)
    assert B % batch_tile == 0
    nb = B // batch_tile
    L = batch_tile * hw

    # ---- host-side algebraic fusion (all linear, exact) ----------------
    # Block-diagonal (grouped) branch weights, zero-embedded in the shared
    # kmax x kmax tap frame, branches concatenated on the output channels.
    w_full = []
    for br, k in zip(params["branches"], incep_ker):
        off = (kmax - k) // 2
        full = jnp.zeros((C_out, C_hid, kmax, kmax), jnp.float32)
        for g in range(groups):
            full = full.at[g * cout_g:(g + 1) * cout_g,
                           g * cin_g:(g + 1) * cin_g,
                           off:off + k, off:off + k].set(
                               br["w"][g * cout_g:(g + 1) * cout_g]
                               .astype(jnp.float32))
        w_full.append(full)
    w_full = jnp.concatenate(w_full, axis=0)        # (nC, C_hid, kmax, kmax)

    # Fold the 1x1 conv1 through the branch taps: K = kmax^2*C_in (not C_hid).
    w_eff = jnp.einsum("ohyx,hc->oyxc", w_full, w1).reshape(nC, K)
    w_eff = w_eff.astype(jnp.bfloat16)              # MXU-native

    # Per-tap validity over the flattened image (kills horizontal/vertical
    # wrap and cross-image bleed introduced by the circular lane rolls).
    hh, ww = np.arange(hw) // W, np.arange(hw) % W
    tap_valid = np.stack([
        ((hh + dy - pad >= 0) & (hh + dy - pad < H)
         & (ww + dx - pad >= 0) & (ww + dx - pad < W))
        for dy in range(kmax) for dx in range(kmax)]).astype(np.float32)

    # conv1 bias folded through the branch weights.  Padding zeroes `hid`
    # (i.e. after the bias), so the folded bias is position-dependent near the
    # borders -> exact (nC, hw) bias map built on the host.
    wb = jnp.einsum("ohyx,h->oyx", w_full, b1).reshape(nC, kmax * kmax)
    b_all = jnp.concatenate([br["b"] for br in params["branches"]]
                            ).astype(jnp.float32)
    bmap = b_all[:, None] + wb @ jnp.asarray(tap_valid)          # (nC, hw) f32

    # Data mask for the im2col rows (repeated per in-channel, tiled per image).
    mask = jnp.asarray(np.tile(np.repeat(tap_valid, C_in, axis=0),
                               (1, batch_tile)), jnp.float32)    # (K, L)

    gnw = jnp.concatenate([br["gn_w"] for br in params["branches"]]
                          ).astype(jnp.float32)[:, None]
    gnb = jnp.concatenate([br["gn_b"] for br in params["branches"]]
                          ).astype(jnp.float32)[:, None]

    # Block-diagonal per-(branch, group) averaging matrix for the GN stats.
    gid = np.arange(nC) // cpg
    mavg = jnp.asarray((gid[:, None] == gid[None, :]).astype(np.float32)
                       / float(hw * cpg))

    # NCHW in: channels on sublanes, flattened spatial on lanes, no transposes.
    x_flat = x_nchw.reshape(B, C_in, hw).astype(jnp.float32)

    kernel = _make_fused_kernel(W, C_out, n_br, kmax, pad, hw, batch_tile)

    flops = 2 * B * nC * K * hw + 10 * B * nC * hw
    bytes_accessed = (B * C_in * hw * 4 + B * C_out * hw * 4
                      + nb * (nC * K * 2 + K * L * 4 + nC * hw * 4
                              + nC * nC * 4 + 4 * nC * 4))

    out = pl.pallas_call(
        kernel,
        out_shape=jax.ShapeDtypeStruct((B, C_out, hw), jnp.float32),
        grid=(nb,),
        in_specs=[
            pl.BlockSpec((batch_tile, C_in, hw), lambda i: (i, 0, 0)),  # x
            pl.BlockSpec((nC, K), lambda i: (0, 0)),          # fused weights
            pl.BlockSpec((K, L), lambda i: (0, 0)),           # tap validity
            pl.BlockSpec((nC, hw), lambda i: (0, 0)),         # bias map
            pl.BlockSpec((nC, 1), lambda i: (0, 0)),          # GN gamma
            pl.BlockSpec((nC, 1), lambda i: (0, 0)),          # GN beta
            pl.BlockSpec((nC, nC), lambda i: (0, 0)),         # group averaging
        ],
        out_specs=pl.BlockSpec((batch_tile, C_out, hw), lambda i: (i, 0, 0)),
        compiler_params=pltpu.CompilerParams(
            dimension_semantics=("parallel",)),
        cost_estimate=pl.CostEstimate(flops=flops, transcendentals=B * nC,
                                      bytes_accessed=bytes_accessed),
    )(x_flat, w_eff, mask, bmap, gnw, gnb, mavg)

    return out.reshape(B, C_out, H, W)              # free: already NCHW


def init_params(key, C_in, C_hid, C_out, incep_ker=(3, 5), groups=8):
    # Mirrors GroupConv2d.__init__: fall back to groups=1 if not divisible.
    if C_hid % groups != 0:
        groups = 1
    keys = jax.random.split(key, 2 + 4 * len(incep_ker))
    cin_g = C_hid // groups
    params = {
        "conv1_w": 0.2 * jax.random.normal(keys[0], (C_hid, C_in), jnp.float32),
        "conv1_b": 0.1 * jax.random.normal(keys[1], (C_hid,), jnp.float32),
        "branches": [],
    }
    ki = 2
    for k in incep_ker:
        w = 0.2 * jax.random.normal(keys[ki], (C_out, cin_g, k, k), jnp.float32)
        b = 0.1 * jax.random.normal(keys[ki + 1], (C_out,), jnp.float32)
        gn_w = 1.0 + 0.1 * jax.random.normal(keys[ki + 2], (C_out,), jnp.float32)
        gn_b = 0.1 * jax.random.normal(keys[ki + 3], (C_out,), jnp.float32)
        ki += 4
        params["branches"].append({"w": w, "b": b, "gn_w": gn_w, "gn_b": gn_b})
    return params, groups


def ref_forward(x_nchw, params, incep_ker, groups):
    """Pure-JAX (lax.conv) reference of the PyTorch forward."""
    w1 = params["conv1_w"][:, :, None, None]
    hid = lax.conv_general_dilated(
        x_nchw, w1, (1, 1), "VALID",
        dimension_numbers=("NCHW", "OIHW", "NCHW")) \
        + params["conv1_b"][None, :, None, None]
    out = 0.0
    for br, k in zip(params["branches"], incep_ker):
        p = k // 2
        y = lax.conv_general_dilated(
            hid, br["w"], (1, 1), [(p, p), (p, p)],
            dimension_numbers=("NCHW", "OIHW", "NCHW"),
            feature_group_count=groups) + br["b"][None, :, None, None]
        B, C, H, W = y.shape
        yg = y.reshape(B, groups, C // groups, H, W)
        mean = jnp.mean(yg, axis=(2, 3, 4), keepdims=True)
        var = jnp.var(yg, axis=(2, 3, 4), keepdims=True)
        yn = ((yg - mean) / jnp.sqrt(var + 1e-5)).reshape(B, C, H, W)
        yn = yn * br["gn_w"][None, :, None, None] + br["gn_b"][None, :, None, None]
        out = out + jnp.where(yn >= 0, yn, 0.2 * yn)
    return out


if __name__ == "__main__":
    # B=4 so the batch-tiled path (TILE_B=2, 2 grid steps) is exercised.
    B, C_in, C_hid, C_out, H, W = 4, 4, 16, 16, 16, 16
    incep_ker = (3, 5)
    key = jax.random.PRNGKey(0)
    kx, kp = jax.random.split(key)
    x = jax.random.normal(kx, (B, C_in, H, W), jnp.float32)

    params, groups = init_params(kp, C_in, C_hid, C_out, incep_ker, groups=8)

    out = ginception_st_forward(x, params, incep_ker=incep_ker, groups=groups)
    out = jax.block_until_ready(out)

    ref = ref_forward(x, params, incep_ker, groups)
    assert out.shape == (B, C_out, H, W)
    # bf16 MXU operands (f32 accumulation) -> ~1e-2-level post-GroupNorm error;
    # 3e-2 tolerance still catches any structural (tap/mask/group/bias) bug.
    np.testing.assert_allclose(np.asarray(out), np.asarray(ref),
                               atol=3e-2, rtol=3e-2)
    print("KERNEL_OK")
</pallas_src>

<mosaic_0001>
module attributes {stable_mosaic.version = 11 : i64} {
  func.func @kernel(%arg0: i32, %arg1: memref<2x4x256xf32, #tpu.memory_space<vmem>>, %arg2: memref<32x100xbf16, #tpu.memory_space<vmem>>, %arg3: memref<100x512xf32, #tpu.memory_space<vmem>>, %arg4: memref<32x256xf32, #tpu.memory_space<vmem>>, %arg5: memref<32x1xf32, #tpu.memory_space<vmem>>, %arg6: memref<32x1xf32, #tpu.memory_space<vmem>>, %arg7: memref<32x32xf32, #tpu.memory_space<vmem>>, %arg8: memref<2x16x256xf32, #tpu.memory_space<vmem>>) attributes {dimension_semantics = [#tpu.dimension_semantics<parallel>], iteration_bounds = array<i64: 2>, scalar_prefetch = 0 : i64, scratch_operands = 0 : i64, tpu.core_type = #tpu.core_type<tc>, window_params = [{transform_indices = @transform_0, window_bounds = array<i64: 2, 4, 256>}, {pipeline_mode = #tpu.pipeline_mode<synchronous>, transform_indices = @transform_1, window_bounds = array<i64: 32, 100>}, {pipeline_mode = #tpu.pipeline_mode<synchronous>, transform_indices = @transform_2, window_bounds = array<i64: 100, 512>}, {pipeline_mode = #tpu.pipeline_mode<synchronous>, transform_indices = @transform_3, window_bounds = array<i64: 32, 256>}, {pipeline_mode = #tpu.pipeline_mode<synchronous>, transform_indices = @transform_4, window_bounds = array<i64: 32, 1>}, {pipeline_mode = #tpu.pipeline_mode<synchronous>, transform_indices = @transform_5, window_bounds = array<i64: 32, 1>}, {pipeline_mode = #tpu.pipeline_mode<synchronous>, transform_indices = @transform_6, window_bounds = array<i64: 32, 32>}, {transform_indices = @transform_7, window_bounds = array<i64: 2, 16, 256>}]} {
    %c0 = arith.constant 0 : index
    %c0_0 = arith.constant 0 : index
    %c0_1 = arith.constant 0 : index
    %0 = vector.load %arg1[%c0, %c0_0, %c0_1] : memref<2x4x256xf32, #tpu.memory_space<vmem>>, vector<1x4x256xf32>
    %1 = vector.shape_cast %0 : vector<1x4x256xf32> to vector<4x256xf32>
    %c1 = arith.constant 1 : index
    %c0_2 = arith.constant 0 : index
    %c0_3 = arith.constant 0 : index
    %2 = vector.load %arg1[%c1, %c0_2, %c0_3] : memref<2x4x256xf32, #tpu.memory_space<vmem>>, vector<1x4x256xf32>
    %3 = vector.shape_cast %2 : vector<1x4x256xf32> to vector<4x256xf32>
    %4 = tpu.concatenate %1, %3 in 1 : vector<4x256xf32>, vector<4x256xf32> -> vector<4x512xf32>
    %c34_i32 = arith.constant 34 : i32
    %5 = tpu.dynamic_rotate %4 by %c34_i32 dim 1 : vector<4x512xf32>, i32 -> vector<4x512xf32>
    %c33_i32 = arith.constant 33 : i32
    %6 = tpu.dynamic_rotate %4 by %c33_i32 dim 1 : vector<4x512xf32>, i32 -> vector<4x512xf32>
    %c32_i32 = arith.constant 32 : i32
    %7 = tpu.dynamic_rotate %4 by %c32_i32 dim 1 : vector<4x512xf32>, i32 -> vector<4x512xf32>
    %c31_i32 = arith.constant 31 : i32
    %8 = tpu.dynamic_rotate %4 by %c31_i32 dim 1 : vector<4x512xf32>, i32 -> vector<4x512xf32>
    %c30_i32 = arith.constant 30 : i32
    %9 = tpu.dynamic_rotate %4 by %c30_i32 dim 1 : vector<4x512xf32>, i32 -> vector<4x512xf32>
    %c18_i32 = arith.constant 18 : i32
    %10 = tpu.dynamic_rotate %4 by %c18_i32 dim 1 : vector<4x512xf32>, i32 -> vector<4x512xf32>
    %c17_i32 = arith.constant 17 : i32
    %11 = tpu.dynamic_rotate %4 by %c17_i32 dim 1 : vector<4x512xf32>, i32 -> vector<4x512xf32>
    %c16_i32 = arith.constant 16 : i32
    %12 = tpu.dynamic_rotate %4 by %c16_i32 dim 1 : vector<4x512xf32>, i32 -> vector<4x512xf32>
    %c15_i32 = arith.constant 15 : i32
    %13 = tpu.dynamic_rotate %4 by %c15_i32 dim 1 : vector<4x512xf32>, i32 -> vector<4x512xf32>
    %c14_i32 = arith.constant 14 : i32
    %14 = tpu.dynamic_rotate %4 by %c14_i32 dim 1 : vector<4x512xf32>, i32 -> vector<4x512xf32>
    %c2_i32 = arith.constant 2 : i32
    %15 = tpu.dynamic_rotate %4 by %c2_i32 dim 1 : vector<4x512xf32>, i32 -> vector<4x512xf32>
    %c1_i32 = arith.constant 1 : i32
    %16 = tpu.dynamic_rotate %4 by %c1_i32 dim 1 : vector<4x512xf32>, i32 -> vector<4x512xf32>
    %c511_i32 = arith.constant 511 : i32
    %17 = tpu.dynamic_rotate %4 by %c511_i32 dim 1 : vector<4x512xf32>, i32 -> vector<4x512xf32>
    %c510_i32 = arith.constant 510 : i32
    %18 = tpu.dynamic_rotate %4 by %c510_i32 dim 1 : vector<4x512xf32>, i32 -> vector<4x512xf32>
    %c498_i32 = arith.constant 498 : i32
    %19 = tpu.dynamic_rotate %4 by %c498_i32 dim 1 : vector<4x512xf32>, i32 -> vector<4x512xf32>
    %c497_i32 = arith.constant 497 : i32
    %20 = tpu.dynamic_rotate %4 by %c497_i32 dim 1 : vector<4x512xf32>, i32 -> vector<4x512xf32>
    %c496_i32 = arith.constant 496 : i32
    %21 = tpu.dynamic_rotate %4 by %c496_i32 dim 1 : vector<4x512xf32>, i32 -> vector<4x512xf32>
    %c495_i32 = arith.constant 495 : i32
    %22 = tpu.dynamic_rotate %4 by %c495_i32 dim 1 : vector<4x512xf32>, i32 -> vector<4x512xf32>
    %c494_i32 = arith.constant 494 : i32
    %23 = tpu.dynamic_rotate %4 by %c494_i32 dim 1 : vector<4x512xf32>, i32 -> vector<4x512xf32>
    %c482_i32 = arith.constant 482 : i32
    %24 = tpu.dynamic_rotate %4 by %c482_i32 dim 1 : vector<4x512xf32>, i32 -> vector<4x512xf32>
    %c481_i32 = arith.constant 481 : i32
    %25 = tpu.dynamic_rotate %4 by %c481_i32 dim 1 : vector<4x512xf32>, i32 -> vector<4x512xf32>
    %c480_i32 = arith.constant 480 : i32
    %26 = tpu.dynamic_rotate %4 by %c480_i32 dim 1 : vector<4x512xf32>, i32 -> vector<4x512xf32>
    %c479_i32 = arith.constant 479 : i32
    %27 = tpu.dynamic_rotate %4 by %c479_i32 dim 1 : vector<4x512xf32>, i32 -> vector<4x512xf32>
    %c478_i32 = arith.constant 478 : i32
    %28 = tpu.dynamic_rotate %4 by %c478_i32 dim 1 : vector<4x512xf32>, i32 -> vector<4x512xf32>
    %29 = tpu.concatenate %5, %6, %7, %8, %9, %10, %11, %12, %13, %14, %15, %16, %4, %17, %18, %19 in 0 : vector<4x512xf32>, vector<4x512xf32>, vector<4x512xf32>, vector<4x512xf32>, vector<4x512xf32>, vector<4x512xf32>, vector<4x512xf32>, vector<4x512xf32>, vector<4x512xf32>, vector<4x512xf32>, vector<4x512xf32>, vector<4x512xf32>, vector<4x512xf32>, vector<4x512xf32>, vector<4x512xf32>, vector<4x512xf32> -> vector<64x512xf32>
    %30 = tpu.concatenate %20, %21, %22, %23, %24, %25, %26, %27, %28 in 0 : vector<4x512xf32>, vector<4x512xf32>, vector<4x512xf32>, vector<4x512xf32>, vector<4x512xf32>, vector<4x512xf32>, vector<4x512xf32>, vector<4x512xf32>, vector<4x512xf32> -> vector<36x512xf32>
    %31 = tpu.concatenate %29, %30 in 0 : vector<64x512xf32>, vector<36x512xf32> -> vector<100x512xf32>
    %c0_4 = arith.constant 0 : index
    %c0_5 = arith.constant 0 : index
    %32 = vector.load %arg3[%c0_4, %c0_5] : memref<100x512xf32, #tpu.memory_space<vmem>>, vector<100x512xf32>
    %33 = arith.mulf %31, %32 : vector<100x512xf32>
    %34 = arith.truncf %33 : vector<100x512xf32> to vector<100x512xbf16>
    %c0_6 = arith.constant 0 : index
    %c0_7 = arith.constant 0 : index
    %35 = vector.load %arg2[%c0_6, %c0_7] : memref<32x100xbf16, #tpu.memory_space<vmem>>, vector<32x100xbf16>
    %cst = arith.constant dense<0.000000e+00> : vector<32x512xf32>
    %36 = tpu.matmul %35, %34, %cst {dimension_numbers = #tpu.dot_dimension_numbers<[1], [0], [0], [1], [0, 0, 1, 1], [], []>} : vector<32x100xbf16>, vector<100x512xbf16>, vector<32x512xf32> -> vector<32x512xf32>
    %c0_8 = arith.constant 0 : index
    %c0_9 = arith.constant 0 : index
    %37 = vector.load %arg7[%c0_8, %c0_9] : memref<32x32xf32, #tpu.memory_space<vmem>>, vector<32x32xf32>
    %c0_10 = arith.constant 0 : index
    %c0_11 = arith.constant 0 : index
    %38 = vector.load %arg5[%c0_10, %c0_11] : memref<32x1xf32, #tpu.memory_space<vmem>>, vector<32x1xf32>
    %c0_12 = arith.constant 0 : index
    %c0_13 = arith.constant 0 : index
    %39 = vector.load %arg6[%c0_12, %c0_13] : memref<32x1xf32, #tpu.memory_space<vmem>>, vector<32x1xf32>
    %c0_14 = arith.constant 0 : index
    %c0_15 = arith.constant 0 : index
    %40 = vector.load %arg4[%c0_14, %c0_15] : memref<32x256xf32, #tpu.memory_space<vmem>>, vector<32x256xf32>
    %41 = vector.extract_strided_slice %36 {offsets = [0, 0], sizes = [32, 256], strides = [1, 1]} : vector<32x512xf32> to vector<32x256xf32>
    %42 = arith.addf %41, %40 : vector<32x256xf32>
    %cst_16 = arith.constant dense<0.000000e+00> : vector<32xf32>
    %43 = vector.multi_reduction <add>, %42, %cst_16 [1] : vector<32x256xf32> to vector<32xf32>
    %44 = vector.shape_cast %43 : vector<32xf32> to vector<32x1xf32>
    %cst_17 = arith.constant dense<0.000000e+00> : vector<32x1xf32>
    %45 = tpu.matmul %37, %44, %cst_17 {dimension_numbers = #tpu.dot_dimension_numbers<[1], [0], [0], [1], [0, 0, 1, 1], [], []>} : vector<32x32xf32>, vector<32x1xf32>, vector<32x1xf32> -> vector<32x1xf32>
    %46 = vector.broadcast %45 : vector<32x1xf32> to vector<32x256xf32>
    %47 = arith.subf %42, %46 : vector<32x256xf32>
    %48 = arith.mulf %47, %47 : vector<32x256xf32>
    %cst_18 = arith.constant dense<0.000000e+00> : vector<32xf32>
    %49 = vector.multi_reduction <add>, %48, %cst_18 [1] : vector<32x256xf32> to vector<32xf32>
    %50 = vector.shape_cast %49 : vector<32xf32> to vector<32x1xf32>
    %cst_19 = arith.constant dense<0.000000e+00> : vector<32x1xf32>
    %51 = tpu.matmul %37, %50, %cst_19 {dimension_numbers = #tpu.dot_dimension_numbers<[1], [0], [0], [1], [0, 0, 1, 1], [], []>} : vector<32x32xf32>, vector<32x1xf32>, vector<32x1xf32> -> vector<32x1xf32>
    %cst_20 = arith.constant 9.99999974E-6 : f32
    %52 = vector.broadcast %cst_20 : f32 to vector<32x1xf32>
    %53 = arith.addf %51, %52 : vector<32x1xf32>
    %54 = math.rsqrt %53 : vector<32x1xf32>
    %55 = vector.broadcast %54 : vector<32x1xf32> to vector<32x256xf32>
    %56 = arith.mulf %47, %55 : vector<32x256xf32>
    %57 = vector.broadcast %38 : vector<32x1xf32> to vector<32x256xf32>
    %58 = arith.mulf %56, %57 : vector<32x256xf32>
    %59 = vector.broadcast %39 : vector<32x1xf32> to vector<32x256xf32>
    %60 = arith.addf %58, %59 : vector<32x256xf32>
    %cst_21 = arith.constant 0.000000e+00 : f32
    %61 = vector.broadcast %cst_21 : f32 to vector<32x256xf32>
    %62 = arith.cmpf oge, %60, %61 : vector<32x256xf32>
    %cst_22 = arith.constant 2.000000e-01 : f32
    %63 = vector.broadcast %cst_22 : f32 to vector<32x256xf32>
    %64 = arith.mulf %63, %60 : vector<32x256xf32>
    %65 = arith.select %62, %60, %64 : vector<32x256xi1>, vector<32x256xf32>
    %66 = vector.extract_strided_slice %65 {offsets = [0, 0], sizes = [16, 256], strides = [1, 1]} : vector<32x256xf32> to vector<16x256xf32>
    %67 = vector.extract_strided_slice %65 {offsets = [16, 0], sizes = [16, 256], strides = [1, 1]} : vector<32x256xf32> to vector<16x256xf32>
    %68 = arith.addf %66, %67 : vector<16x256xf32>
    %c0_23 = arith.constant 0 : index
    %c0_24 = arith.constant 0 : index
    %c0_25 = arith.constant 0 : index
    %69 = vector.load %arg8[%c0_23, %c0_24, %c0_25] : memref<2x16x256xf32, #tpu.memory_space<vmem>>, vector<1x16x256xf32>
    %70 = vector.shape_cast %69 : vector<1x16x256xf32> to vector<16x256xf32>
    %71 = vector.shape_cast %68 : vector<16x256xf32> to vector<1x16x256xf32>
    tpu.vector_store %arg8[%c0_23, %c0_24, %c0_25], %71 {strides = array<i32>} : memref<2x16x256xf32, #tpu.memory_space<vmem>>, vector<1x16x256xf32>,
    %72 = vector.extract_strided_slice %36 {offsets = [0, 256], sizes = [32, 256], strides = [1, 1]} : vector<32x512xf32> to vector<32x256xf32>
    %73 = arith.addf %72, %40 : vector<32x256xf32>
    %cst_26 = arith.constant dense<0.000000e+00> : vector<32xf32>
    %74 = vector.multi_reduction <add>, %73, %cst_26 [1] : vector<32x256xf32> to vector<32xf32>
    %75 = vector.shape_cast %74 : vector<32xf32> to vector<32x1xf32>
    %cst_27 = arith.constant dense<0.000000e+00> : vector<32x1xf32>
    %76 = tpu.matmul %37, %75, %cst_27 {dimension_numbers = #tpu.dot_dimension_numbers<[1], [0], [0], [1], [0, 0, 1, 1], [], []>} : vector<32x32xf32>, vector<32x1xf32>, vector<32x1xf32> -> vector<32x1xf32>
    %77 = vector.broadcast %76 : vector<32x1xf32> to vector<32x256xf32>
    %78 = arith.subf %73, %77 : vector<32x256xf32>
    %79 = arith.mulf %78, %78 : vector<32x256xf32>
    %cst_28 = arith.constant dense<0.000000e+00> : vector<32xf32>
    %80 = vector.multi_reduction <add>, %79, %cst_28 [1] : vector<32x256xf32> to vector<32xf32>
    %81 = vector.shape_cast %80 : vector<32xf32> to vector<32x1xf32>
    %cst_29 = arith.constant dense<0.000000e+00> : vector<32x1xf32>
    %82 = tpu.matmul %37, %81, %cst_29 {dimension_numbers = #tpu.dot_dimension_numbers<[1], [0], [0], [1], [0, 0, 1, 1], [], []>} : vector<32x32xf32>, vector<32x1xf32>, vector<32x1xf32> -> vector<32x1xf32>
    %cst_30 = arith.constant 9.99999974E-6 : f32
    %83 = vector.broadcast %cst_30 : f32 to vector<32x1xf32>
    %84 = arith.addf %82, %83 : vector<32x1xf32>
    %85 = math.rsqrt %84 : vector<32x1xf32>
    %86 = vector.broadcast %85 : vector<32x1xf32> to vector<32x256xf32>
    %87 = arith.mulf %78, %86 : vector<32x256xf32>
    %88 = vector.broadcast %38 : vector<32x1xf32> to vector<32x256xf32>
    %89 = arith.mulf %87, %88 : vector<32x256xf32>
    %90 = vector.broadcast %39 : vector<32x1xf32> to vector<32x256xf32>
    %91 = arith.addf %89, %90 : vector<32x256xf32>
    %cst_31 = arith.constant 0.000000e+00 : f32
    %92 = vector.broadcast %cst_31 : f32 to vector<32x256xf32>
    %93 = arith.cmpf oge, %91, %92 : vector<32x256xf32>
    %cst_32 = arith.constant 2.000000e-01 : f32
    %94 = vector.broadcast %cst_32 : f32 to vector<32x256xf32>
    %95 = arith.mulf %94, %91 : vector<32x256xf32>
    %96 = arith.select %93, %91, %95 : vector<32x256xi1>, vector<32x256xf32>
    %97 = vector.extract_strided_slice %96 {offsets = [0, 0], sizes = [16, 256], strides = [1, 1]} : vector<32x256xf32> to vector<16x256xf32>
    %98 = vector.extract_strided_slice %96 {offsets = [16, 0], sizes = [16, 256], strides = [1, 1]} : vector<32x256xf32> to vector<16x256xf32>
    %99 = arith.addf %97, %98 : vector<16x256xf32>
    %c1_33 = arith.constant 1 : index
    %c0_34 = arith.constant 0 : index
    %c0_35 = arith.constant 0 : index
    %100 = vector.load %arg8[%c1_33, %c0_34, %c0_35] : memref<2x16x256xf32, #tpu.memory_space<vmem>>, vector<1x16x256xf32>
    %101 = vector.shape_cast %100 : vector<1x16x256xf32> to vector<16x256xf32>
    %102 = vector.shape_cast %99 : vector<16x256xf32> to vector<1x16x256xf32>
    tpu.vector_store %arg8[%c1_33, %c0_34, %c0_35], %102 {strides = array<i32>} : memref<2x16x256xf32, #tpu.memory_space<vmem>>, vector<1x16x256xf32>,
    return
  }
  func.func @transform_0(%arg0: i32) -> (i32, i32, i32) {
    %c0_i32 = arith.constant 0 : i32
    %c0_i32_0 = arith.constant 0 : i32
    %c0_i32_1 = arith.constant 0 : i32
    return %arg0, %c0_i32, %c0_i32_0 : i32, i32, i32
  }
  func.func @transform_1(%arg0: i32) -> (i32, i32) {
    %c0_i32 = arith.constant 0 : i32
    %c0_i32_0 = arith.constant 0 : i32
    %c0_i32_1 = arith.constant 0 : i32
    return %c0_i32, %c0_i32_0 : i32, i32
  }
  func.func @transform_2(%arg0: i32) -> (i32, i32) {
    %c0_i32 = arith.constant 0 : i32
    %c0_i32_0 = arith.constant 0 : i32
    %c0_i32_1 = arith.constant 0 : i32
    return %c0_i32, %c0_i32_0 : i32, i32
  }
  func.func @transform_3(%arg0: i32) -> (i32, i32) {
    %c0_i32 = arith.constant 0 : i32
    %c0_i32_0 = arith.constant 0 : i32
    %c0_i32_1 = arith.constant 0 : i32
    return %c0_i32, %c0_i32_0 : i32, i32
  }
  func.func @transform_4(%arg0: i32) -> (i32, i32) {
    %c0_i32 = arith.constant 0 : i32
    %c0_i32_0 = arith.constant 0 : i32
    %c0_i32_1 = arith.constant 0 : i32
    return %c0_i32, %c0_i32_0 : i32, i32
  }
  func.func @transform_5(%arg0: i32) -> (i32, i32) {
    %c0_i32 = arith.constant 0 : i32
    %c0_i32_0 = arith.constant 0 : i32
    %c0_i32_1 = arith.constant 0 : i32
    return %c0_i32, %c0_i32_0 : i32, i32
  }
  func.func @transform_6(%arg0: i32) -> (i32, i32) {
    %c0_i32 = arith.constant 0 : i32
    %c0_i32_0 = arith.constant 0 : i32
    %c0_i32_1 = arith.constant 0 : i32
    return %c0_i32, %c0_i32_0 : i32, i32
  }
  func.func @transform_7(%arg0: i32) -> (i32, i32, i32) {
    %c0_i32 = arith.constant 0 : i32
    %c0_i32_0 = arith.constant 0 : i32
    %c0_i32_1 = arith.constant 0 : i32
    return %arg0, %c0_i32, %c0_i32_0 : i32, i32, i32
  }
}

</mosaic_0001>

<bundles_post_ra>
// kernel: tpu_custom_call.1
= control target key start
LH: loop header
LB: loop body
LE: loop exit
PB: predicated region body
PF: predicated region fallthrough
CT: control target
= control target key end

     0   :  { %s3672_s0 = inlined_call_operand.hbm [shape: f32[4,4,256], index: 0, kind: input, shape index: {}]   ;;  %s3673_s1 = inlined_call_operand.hbm [shape: bf16[32,100], index: 1, kind: input, shape index: {}]   ;;  %s3674_s2 = inlined_call_operand.hbm [shape: f32[100,512], index: 2, kind: input, shape index: {}]   ;;  %s3675_s3 = inlined_call_operand.vmem [shape: f32[32,256], index: 3, kind: input, shape index: {}]   ;;  %s3676_s4 = inlined_call_operand.vmem [shape: f32[32,1], index: 4, kind: input, shape index: {}]   ;;  %s3677_s5 = inlined_call_operand.vmem [shape: f32[32,1], index: 5, kind: input, shape index: {}]   ;;  %s3678_s6 = inlined_call_operand.hbm [shape: f32[32,32], index: 6, kind: input, shape index: {}]   ;;  %s3679_s7 = inlined_call_operand.hbm [shape: f32[4,16,256], index: 7, kind: output, shape index: {}]  }
   0x1   :  { %3686 = sst [smem:[#allocation15_spill]] %s3673_s1 }
   0x2   :  { %12 = vsyncpa [#allocation3], 0 }
   0x3   :  { %14 = vsyncpa [#allocation3 + $0x1], 0 }
   0x4   :  { %15 = vsyncpa [#allocation6], 0 }
   0x5   :  { %16 = vsyncpa [#allocation9], 0 }
   0x6   :  { %17 = vsyncpa [#allocation4], 0 }
   0x7   :  { %19 = vsyncpa [#allocation4 + $0x1], 0  ;;  %s2491_s24 = smov 0   ;;  %s2493_s25 = smov 0  }
   0x8   :  { %s2495_s26 = smov 0   ;;  %s2497_s27 = smov 0  }
   0x9 LB: > { %s2512_s28 = sadd.s32 4294967295, %s2412_s27   ;;  %s1960_s29 = sadd.s32 4294967294, %s2412_s27   ;;  %s2412_s27 = sphi %s2497_s27, %s3709_s27   ;;  %s2408_s26 = sphi %s2495_s26, %s3708_s26   ;;  %s2404_s25 = sphi %s2493_s25, %s3707_s25   ;;  %s2400_s24 = sphi %s2491_s24, %s3706_s24  }
   0xa   : > { %p45_p0 = scmp.ne.s32.totalorder %s2404_s25, %s2400_s24  ;;  %p3680_p1 = scmp.eq.s32.totalorder %s2512_s28, 0 }
   0xb   : > { %p201_p3 = scmp.eq.s32.totalorder %s1960_s29, 1  ;;  %p1961_p5 = scmp.ge.s32.totalorder %s2412_s27, 1 }
   0xc   : > { %p2521_p4 = por %p3680_p1, %p45_p0  ;;  %p208_p7 = scmp.lt.s32.totalorder %s2412_s27, 3 }
   0xd   : > { %p2526_p6 = por %p201_p3, %p45_p0  ;;  %s2414_s10 = smov [#allocation5]  }
   0xe   : > { %s3687_s30 = scalar_select %p2521_p4, 1, 0 }
   0xf   : > { %s3688_s8 = scalar_select %p2526_p6, 1, 0 }
  0x10   : > { %p2531_p8 = pnand %p1961_p5, %p208_p7  ;;  %s220_s11 = sshll.u32 %s2414_s10, 4  ;;  %s221_s11 = int_to_ptr.vmem [resolvable:$true] %s220_s11 }
  0x11   : > { %s2415_s13 = smov [#allocation7]   ;;  %s2245_s15 = scalar_lea.vmem %s221_s11, 256 }
  0x12   : > { %s3689_s9 = scalar_select %p2531_p8, 1, 0 }
  0x13   : > { %p2119_p9 = pneg %p2531_p8  ;;  %s233_s14 = sshll.u32 %s2415_s13, 4  ;;  %s234_s14 = int_to_ptr.vmem [resolvable:$true] %s233_s14 }
  0x14   : > { %p2246_p13 = scmp.ne.s32.totalorder %s221_s11, %s2245_s15  ;;  %p2253_p5 = scmp.lt.s32.totalorder %s221_s11, %s221_s11 }
  0x15   : > { %p2540_p11 = pnand %p2119_p9, %p3680_p1  ;;  %p2254_p7 = scmp.lt.s32.totalorder %s2245_s15, %s2245_s15 }
  0x17   : > { %p2236_p12 = pneg %p2540_p11  ;;  %p2255_p10 = por %p2254_p7, %p2253_p5 }
  0x19   : > { %p2248_p0 = pnand %p2246_p13, %p2236_p12 }
  0x1b   : > { %p2249_p3 = pneg %p2248_p0 }
  0x1d   : > { %p2256_p9 = pnand %p2255_p10, %p2249_p3 }
  0x1f   : > { %2259 = shalt.err (!%p2256_p9)
}
  0x20   : > { %s2416_s16 = smov 64   ;;  %s2417_s17 = smov 4  }
  0x21   : > { %s3691_s1 = sld [smem:[#allocation15_spill]]  ;;  %s2271_s20 = scalar_lea.vmem %s234_s14, 6656 }
  0x22   : > { %p2272_p1 = scmp.ne.s32.totalorder %s234_s14, %s2271_s20  ;;  %p2279_p2 = scmp.lt.s32.totalorder %s234_s14, %s234_s14 }
  0x23   : > { %p2280_p6 = scmp.lt.s32.totalorder %s2271_s20, %s2271_s20 }
  0x24   : > { %p2274_p13 = pnand %p2272_p1, %p2236_p12 }
  0x25   : > { %p2281_p5 = por %p2280_p6, %p2279_p2 }
  0x26   : > { %p2275_p0 = pneg %p2274_p13 }
  0x27   : > { %2122 = dma.hbm_to_vmem [thread:$0]  (!%p2540_p11), %s3691_s1, 256, %s221_s11, [#allocation6], %s2416_s16, %s2416_s16, %s2417_s17  }
  0x28   : > { %p2282_p10 = pnand %p2281_p5, %p2275_p0 }
  0x2a   : > { %2285 = shalt.err (!%p2282_p10)
}
  0x2b   : > { %s2418_s21 = smov 512   ;;  %s2419_s22 = smov 32  }
  0x2c   : > { %2125 = dma.hbm_to_vmem [thread:$0]  (!%p2540_p11), %s3674_s2, 6656, %s234_s14, [#allocation6], %s2418_s21, %s2418_s21, %s2419_s22  }
  0x2d   : > { %s2420_s10 = smov [#allocation8]  }
  0x2e   : > { %s255_s11 = sshll.u32 %s2420_s10, 4  ;;  %s256_s11 = int_to_ptr.vmem [resolvable:$true] %s255_s11 }
  0x2f   : > { %s2297_s13 = scalar_lea.vmem %s256_s11, 512  ;;  %p2305_p6 = scmp.lt.s32.totalorder %s256_s11, %s256_s11 }
  0x30   : > { %p2298_p1 = scmp.ne.s32.totalorder %s256_s11, %s2297_s13  ;;  %p2306_p7 = scmp.lt.s32.totalorder %s2297_s13, %s2297_s13 }
  0x32   : > { %p2300_p3 = pnand %p2298_p1, %p2236_p12  ;;  %p2307_p9 = por %p2306_p7, %p2305_p6 }
  0x34   : > { %p2301_p2 = pneg %p2300_p3 }
  0x36   : > { %p2308_p13 = pnand %p2307_p9, %p2301_p2 }
  0x38   : > { %2311 = shalt.err (!%p2308_p13)
}
  0x39   : > { %s3681_s15 = smov 128   ;;  %s3682_s14 = smov 8  }
  0x3a   : > { %2128 = dma.hbm_to_vmem [thread:$0]  (!%p2540_p11), %s3678_s6, 512, %s256_s11, [#allocation9], %s3681_s15, %s3681_s15, %s3682_s14  }
  0x3b   : > { %s2574_s18 = sadd.s32 1, %s2412_s27   ;;  %s32_s20 = sadd.s32 1, %s2408_s26 }
  0x3c   : > { %s29_s19 = ssub.s32 %s2412_s27, %s2574_s18  ;;  %p39_p0 = scmp.ne.s32.totalorder %s2408_s26, %s2404_s25 }
  0x3d   : > { %p30_p12 = scmp.eq.s32.totalorder %s29_s19, 0  ;;  %p40_p5 = scmp.eq.s32.totalorder %s2412_s27, 0 }
  0x3e   : > { %p2140_p10 = scmp.lt.s32.totalorder %s2412_s27, 2  ;;  %p3692_p3 = scmp.eq.s32.totalorder %s2512_s28, 1 }
  0x3f   : > { %s2584_s21 = scalar_select %p30_p12, %s2408_s26, %s32_s20  }
  0x40   : > { %p41_p1 = por %p40_p5, %p39_p0  ;;  %p2588_p2 = por %p3692_p3, %p39_p0 }
  0x41   : > { %s269_s22 = sand.u32 1, %s2408_s26   ;;  %s2012_s23 = sshll.u32 %s2412_s27, 8 }
  0x42   : > { %s3693_s12 = scalar_select %p2588_p2, 1, 0 }
  0x43   : > { %s1966_s29 = sshll.u32 %s269_s22, 4  ;;  %s2597_s13 = scalar_lea.hbm %s3672_s0, %s2012_s23 }
  0x44   : > { %s273_s16 = scalar_lea.vmem [#allocation2], %s1966_s29  ;;  %p2599_p11 = pnand %p2140_p10, %p41_p1 }
  0x45   : > { %s281_s17 = sshll.u32 %s273_s16, 4  ;;  %s2605_s20 = scalar_lea.sflag [#allocation3], %s269_s22  ;;  %s2603_s17 = int_to_ptr.vmem [resolvable:$true] %s281_s17 }
  0x46   : > { %s2312_s15 = scalar_lea.hbm %s2597_s13, 256  ;;  %p2314_p7 = pneg %p2599_p11 }
  0x47   : > { %p2313_p6 = scmp.ne.s32.totalorder %s2597_s13, %s2312_s15  ;;  %s2317_s29 = scalar_lea.hbm %s3672_s0, 512 }
  0x48   : > { %p2318_p12 = scmp.lt.s32.totalorder %s2597_s13, %s3672_s0  ;;  %p2319_p0 = scmp.lt.s32.totalorder %s2317_s29, %s2312_s15 }
  0x49   : > { %p2315_p9 = pnand %p2314_p7, %p2313_p6 }
  0x4a   : > { %p2320_p5 = por %p2319_p0, %p2318_p12 }
  0x4b   : > { %p2316_p13 = pneg %p2315_p9 }
  0x4d   : > { %p2321_p10 = pnand %p2320_p5, %p2316_p13 }
  0x4f   : > { %2324 = shalt.err (!%p2321_p10)
}
  0x50   : > { %s2325_s22 = scalar_lea.vmem %s2603_s17, 256  ;;  %s2423_s14 = smov [#allocation2]  }
  0x51   : > { %p2326_p1 = scmp.ne.s32.totalorder %s2603_s17, %s2325_s22  ;;  %s2330_s1 = sshll.u32 %s2423_s14, 4  ;;  %s2331_s1 = int_to_ptr.vmem [resolvable:$false] %s2330_s1 }
  0x52   : > { %s2332_s23 = scalar_lea.vmem %s2331_s1, 512  ;;  %p2333_p9 = scmp.lt.s32.totalorder %s2603_s17, %s2331_s1 }
  0x53   : > { %p2328_p3 = pnand %p2326_p1, %p2314_p7  ;;  %p2334_p2 = scmp.lt.s32.totalorder %s2332_s23, %s2325_s22 }
  0x55   : > { %p2329_p6 = pneg %p2328_p3  ;;  %p2335_p4 = por %p2334_p2, %p2333_p9 }
  0x57   : > { %p2336_p8 = pnand %p2335_p4, %p2329_p6 }
  0x59   : > { %2339 = shalt.err (!%p2336_p8)
}
  0x5a   : > { %s3695_s15 = smov 8   ;;  %s3696_s10 = smov 128  }
  0x5b   : > { %2132 = dma.hbm_to_vmem [thread:$0]  (!%p2599_p11), %s2597_s13, 256, %s2603_s17, %s2605_s20, %s3696_s10, %s3696_s10, %s3695_s15  }
  0x5c   : > { %p3697_p7 = scmp.ne.s32.totalorder %s3689_s9, 0 }
  0x5d   : > { %s2632_s14 = sand.u32 (!%p3697_p7), 1, %s2404_s25   ;;  %p3698_p4 = scmp.ne.s32.totalorder (!%p3697_p7), %s3687_s30, 0 }
  0x5e   : > { %293 = sbr.rel (%p3697_p7) target bundleno = 1620 (0x654), region = 48  ;;  %s1971_s1 = sshll.u32 (!%p3697_p7), %s2632_s14, 4 }
  0x5f   : > { %s296_s29 = scalar_lea.sflag (!%p3697_p7), [#allocation3], %s2632_s14  ;;  %s299_s11 = scalar_lea.vmem (!%p3697_p7), [#allocation2], %s1971_s1 }
  0x63   : > { %2383 = dma.done.wait (%p3698_p4), %s296_s29, 256  }
  0x64   : > { %2385 = vsyncadd (%p3698_p4), %s296_s29, 4294967040  ;;  %p3699_p8 = scmp.eq.s32.totalorder %s2512_s28, 0 }
  0x66   : > { %2387 = dma.done.wait (%p3699_p8), [#allocation6], 6912   ;;  %p3700_p2 = pmov %p3699_p8 }
  0x68   : > { %2389 = vsyncadd (%p3700_p2), [#allocation6], 4294960384  ;;  %p3701_p11 = pmov %p3700_p2 }
  0x69   : > { %p3702_p13 = pmov %p3700_p2 }
  0x6a   : > { %2391 = dma.done.wait (%p3701_p11), [#allocation9], 512  }
  0x6b   : > { %2393 = vsyncadd (%p3702_p13), [#allocation9], 4294966784  ;;  %v2648_v0 = vld [vmem:[%s299_s11 + $0x8] sm:$0xff]  ;;  %v2650_v1 = vld [vmem:[%s299_s11] sm:$0xff]  ;;  %s2424_s9 = smov 94   ;;  %s2425_s30 = smov 97   ;;  %v362_v6 = vlaneseq }
  0x6c   : > { %659 = vrot.lane.b32.xlu1 %v2648_v0, %s2424_s9  ;;  %655 = vrot.lane.b32.xlu0 %v2650_v1, %s2424_s9  ;;  %v2658_v2 = vcombine.high %v2650_v1, %v2650_v1  ;;  %s2426_s13 = smov 95   ;;  %s2427_s17 = smov 98   ;;  %v2710_v3 = vcombine.high %v2648_v0, %v2648_v0  ;;  %v910_v10 = vld [vmem:[#allocation7 + $0x188] sm:$0xf]  ;;  %v909_v11 = vld [vmem:[#allocation7 + $0x180] sm:$0xf] }
  0x6d   : > { %s2428_s19 = smov 96   ;;  %s2429_s20 = smov 112   ;;  %v2786_v8 = vand.u32 127, %v362_v6  ;;  %vm1014_vm1 = vcmask 1041408   ;;  %vm764_vm5 = vcmask 1043456   ;;  %v902_v36 = vld [vmem:[#allocation7 + $0x148] sm:$0xff] }
  0x6e   : > { %s2430_s16 = smov 110   ;;  %s2431_s22 = smov 113   ;;  %v906_v37 = vld [vmem:[#allocation7 + $0x168] sm:$0xff]  ;;  %v901_v49 = vld [vmem:[#allocation7 + $0x140] sm:$0xff] }
  0x6f   : > { %s2432_s23 = smov 111   ;;  %s2433_s15 = smov 127   ;;  %vm663_vm0 = vcmp.lt.s32.totalorder %v2786_v8, 94  ;;  %vm624_vm2 = vcmp.lt.s32.totalorder %v2786_v8, 97  ;;  %vm650_vm3 = vcmp.lt.s32.totalorder %v2786_v8, 95  ;;  %vm611_vm4 = vcmp.lt.s32.totalorder %v2786_v8, 98 }
  0x70   : > { %620 = vrot.lane.b32.xlu0 %v2648_v0, %s2425_s30  ;;  %618 = vrot.lane.b32.xlu1 %v2658_v2, %s2425_s30  ;;  %s2434_s10 = smov 114   ;;  %s2435_s1 = smov 126   ;;  %vm637_vm6 = vcmp.lt.s32.totalorder %v2786_v8, 96  ;;  %v905_v50 = vld [vmem:[#allocation7 + $0x160] sm:$0xff]  ;;  %vm572_vm7 = vcmp.lt.s32.totalorder %v2786_v8, 112  ;;  %vm598_vm8 = vcmp.lt.s32.totalorder %v2786_v8, 110 }
  0x71   : > { %s2436_s29 = smov 14   ;;  %s2437_s11 = smov 1   ;;  %vm559_vm9 = vcmp.lt.s32.totalorder %v2786_v8, 113  ;;  %vm585_vm10 = vcmp.lt.s32.totalorder %v2786_v8, 111  ;;  %vm520_vm11 = vcmp.lt.s32.totalorder %v2786_v8, 127  ;;  %vm546_vm12 = vcmp.lt.s32.totalorder %v2786_v8, 114 }
  0x72   : > { %vm533_vm13 = vcmp.lt.s32.totalorder %v2786_v8, 126  ;;  %vm481_vm14 = vcmp.lt.s32.totalorder %v2786_v8, 14  ;;  %vm507_vm15 = vcmp.lt.s32.totalorder %v2786_v8, 1  ;;  %p3703_p0 = scmp.ne.s32.totalorder %s3693_s12, 0 }
  0x74   : > { %644 = vrot.lane.b32.xlu1 %v2658_v2, %s2426_s13  ;;  %657 = vrot.lane.b32.xlu0 %v2658_v2, %s2424_s9 }
  0x78   : > { %616 = vrot.lane.b32.xlu1 %v2650_v1, %s2425_s30  ;;  %646 = vrot.lane.b32.xlu0 %v2648_v0, %s2426_s13 }
  0x7c   : > { %605 = vrot.lane.b32.xlu1 %v2658_v2, %s2427_s17  ;;  %642 = vrot.lane.b32.xlu0 %v2650_v1, %s2426_s13 }
  0x80   : > { %631 = vrot.lane.b32.xlu1 %v2658_v2, %s2428_s19  ;;  %607 = vrot.lane.b32.xlu0 %v2648_v0, %s2427_s17 }
  0x84   : > { %603 = vrot.lane.b32.xlu1 %v2650_v1, %s2427_s17  ;;  %633 = vrot.lane.b32.xlu0 %v2648_v0, %s2428_s19 }
  0x88   : > { %566 = vrot.lane.b32.xlu1 %v2658_v2, %s2429_s20  ;;  %629 = vrot.lane.b32.xlu0 %v2650_v1, %s2428_s19 }
  0x8c   : > { %592 = vrot.lane.b32.xlu1 %v2658_v2, %s2430_s16  ;;  %568 = vrot.lane.b32.xlu0 %v2648_v0, %s2429_s20 }
  0x90   : > { %564 = vrot.lane.b32.xlu1 %v2650_v1, %s2429_s20  ;;  %594 = vrot.lane.b32.xlu0 %v2648_v0, %s2430_s16 }
  0x94   : > { %553 = vrot.lane.b32.xlu1 %v2658_v2, %s2431_s22  ;;  %590 = vrot.lane.b32.xlu0 %v2650_v1, %s2430_s16 }
  0x98   : > { %579 = vrot.lane.b32.xlu1 %v2658_v2, %s2432_s23  ;;  %555 = vrot.lane.b32.xlu0 %v2648_v0, %s2431_s22 }
  0x9c   : > { %551 = vrot.lane.b32.xlu1 %v2650_v1, %s2431_s22  ;;  %581 = vrot.lane.b32.xlu0 %v2648_v0, %s2432_s23 }
  0xa0   : > { %661 = vrot.lane.b32.xlu1 %v2710_v3, %s2424_s9  ;;  %577 = vrot.lane.b32.xlu0 %v2650_v1, %s2432_s23  ;;  %s2438_s9 = smov 15  }
  0xa4   : > { %516 = vrot.lane.b32.xlu1 %v2648_v0, %s2433_s15  ;;  %514 = vrot.lane.b32.xlu0 %v2658_v2, %s2433_s15 }
  0xa8   : > { %542 = vrot.lane.b32.xlu1 %v2648_v0, %s2434_s10  ;;  %540 = vrot.lane.b32.xlu0 %v2658_v2, %s2434_s10 }
  0xac   : > { %648 = vrot.lane.b32.xlu1 %v2710_v3, %s2426_s13  ;;  %622 = vrot.lane.b32.xlu0 %v2710_v3, %s2425_s30  ;;  %s2439_s30 = smov 2   ;;  %s2440_s13 = smov 18  }
  0xb0   : > { %538 = vrot.lane.b32.xlu1 %v2650_v1, %s2434_s10  ;;  %512 = vrot.lane.b32.xlu0 %v2650_v1, %s2433_s15 }
  0xb4   : > { %529 = vrot.lane.b32.xlu1 %v2648_v0, %s2435_s1  ;;  %527 = vrot.lane.b32.xlu0 %v2658_v2, %s2435_s1 }
  0xb8   : > { %635 = vrot.lane.b32.xlu1 %v2710_v3, %s2428_s19  ;;  %609 = vrot.lane.b32.xlu0 %v2710_v3, %s2427_s17  ;;  %s2441_s17 = smov 16   ;;  %s2442_s19 = smov 30  }
  0xbc   : > { %473 = vrot.lane.b32.xlu1 %v2650_v1, %s2436_s29  ;;  %525 = vrot.lane.b32.xlu0 %v2650_v1, %s2435_s1 }
  0xc0   : > { %499 = vrot.lane.b32.xlu1 %v2650_v1, %s2437_s11  ;;  %475 = vrot.lane.b32.xlu0 %v2658_v2, %s2436_s29 }
  0xc4   : > { %570 = vrot.lane.b32.xlu1 %v2710_v3, %s2429_s20  ;;  %501 = vrot.lane.b32.xlu0 %v2658_v2, %s2437_s11  ;;  %s2443_s20 = smov 17  }
  0xc8   : > { %479 = vrot.lane.b32.xlu1 %v2710_v3, %s2436_s29  ;;  %596 = vrot.lane.b32.xlu0 %v2710_v3, %s2430_s16  ;;  %s2444_s16 = smov 33  }
  0xcc   : > { %460 = vrot.lane.b32.xlu1 %v2650_v1, %s2438_s9  ;;  %505 = vrot.lane.b32.xlu0 %v2710_v3, %s2437_s11 }
  0xd0   : > { %486 = vrot.lane.b32.xlu1 %v2650_v1, %s2439_s30  ;;  %462 = vrot.lane.b32.xlu0 %v2658_v2, %s2438_s9 }
  0xd4   : > { %557 = vrot.lane.b32.xlu1 %v2710_v3, %s2431_s22  ;;  %488 = vrot.lane.b32.xlu0 %v2658_v2, %s2439_s30  ;;  %s2445_s22 = smov 31  }
  0xd8   : > { %466 = vrot.lane.b32.xlu1 %v2710_v3, %s2438_s9  ;;  %583 = vrot.lane.b32.xlu0 %v2710_v3, %s2432_s23  ;;  %s2446_s23 = smov 34  }
  0xdc   : > { %421 = vrot.lane.b32.xlu1 %v2650_v1, %s2440_s13  ;;  %492 = vrot.lane.b32.xlu0 %v2710_v3, %s2439_s30 }
  0xde   : > { %v2776_v4 = vpop.permute.xlu1 %659  ;;  %v2778_v5 = vpop.permute.xlu0 %655 }
  0xe0   : > { %447 = vrot.lane.b32.xlu1 %v2650_v1, %s2441_s17  ;;  %423 = vrot.lane.b32.xlu0 %v2658_v2, %s2440_s13 }
  0xe2   : > { %v2784_v7 = vpop.permute.xlu0 %620  ;;  %v619_v9 = vpop.permute.xlu1 %618 }
  0xe3   : > { %v626_v25 = vsel %vm624_vm2, %v619_v9, %v2784_v7 }
  0xe4   : > { %518 = vrot.lane.b32.xlu1 %v2710_v3, %s2433_s15  ;;  %449 = vrot.lane.b32.xlu0 %v2658_v2, %s2441_s17  ;;  %v826_v30 = vrot.slane %v626_v25, 4  ;;  %s2447_s15 = smov 32  }
  0xe6   : > { %v645_v12 = vpop.permute.xlu1 %644  ;;  %v658_v13 = vpop.permute.xlu0 %657 }
  0xe7   : > { %v666_v14 = vsel %vm663_vm0, %v2778_v5, %v658_v13  ;;  %v665_v15 = vsel %vm663_vm0, %v658_v13, %v2776_v4 }
  0xe8   : > { %427 = vrot.lane.b32.xlu1 %v2710_v3, %s2440_s13  ;;  %544 = vrot.lane.b32.xlu0 %v2710_v3, %s2434_s10  ;;  %v962_v16 = vmul.f32 %v910_v10, %v665_v15  ;;  %v961_v17 = vmul.f32 %v909_v11, %v666_v14 }
  0xea   : > { %v2803_v18 = vpop.permute.xlu1 %616  ;;  %v2805_v19 = vpop.permute.xlu0 %646  ;;  %v990_v20 = vpack.c.bf16 %v962_v16, %v962_v16  ;;  %v989_v21 = vpack.c.bf16 %v961_v17, %v961_v17 }
  0xeb   : > { %v652_v28 = vsel %vm650_vm3, %v645_v12, %v2805_v19  ;;  %v627_v31 = vsel %vm624_vm2, %v2803_v18, %v619_v9 }
  0xec   : > { %408 = vrot.lane.b32.xlu1 %v2650_v1, %s2442_s19  ;;  %453 = vrot.lane.b32.xlu0 %v2710_v3, %s2441_s17  ;;  %v1016_v22 = vsel %vm1014_vm1, %v989_v21, 0  ;;  %v838_v32 = vrot.slane %v652_v28, 4  ;;  %v825_v41 = vrot.slane %v627_v31, 4  ;;  %v898_v21 = vld [vmem:[#allocation7 + $0x128] sm:$0xff]  ;;  %v912_v31 = vld [vmem:[#allocation7 + $0x198] sm:$0xf] }
  0xed   : > { %1979 = vmatprep.subr.msk.bf16.mxu0 %vm1014_vm1, %v990_v20  ;;  %v894_v20 = vld [vmem:[#allocation7 + $0x108] sm:$0xff] }
  0xee   : > { %1030 = vmatpush1.bf16.msra.mxu0 %v1016_v22  ;;  %v606_v23 = vpop.permute.xlu1 %605  ;;  %v2814_v24 = vpop.permute.xlu0 %642 }
  0xef   : > { %v653_v38 = vsel %vm650_vm3, %v2814_v24, %v645_v12 }
  0xf0   : > { %434 = vrot.lane.b32.xlu1 %v2650_v1, %s2443_s20  ;;  %410 = vrot.lane.b32.xlu0 %v2658_v2, %s2442_s19  ;;  %v837_v45 = vrot.slane %v653_v38, 4 }
  0xf2   : > { %v632_v26 = vpop.permute.xlu1 %631  ;;  %v2825_v27 = vpop.permute.xlu0 %607 }
  0xf3   : > { %v613_v29 = vsel %vm611_vm4, %v606_v23, %v2825_v27 }
  0xf4   : > { %531 = vrot.lane.b32.xlu1 %v2710_v3, %s2435_s1  ;;  %436 = vrot.lane.b32.xlu0 %v2658_v2, %s2443_s20  ;;  %v854_v33 = vsel %vm764_vm5, %v613_v29, %v826_v30  ;;  %s2449_s1 = smov [#allocation10]  }
  0xf5   : > { %v954_v43 = vmul.f32 %v902_v36, %v854_v33 }
  0xf6   : > { %v2842_v34 = vpop.permute.xlu1 %603  ;;  %v2844_v35 = vpop.permute.xlu0 %633 }
  0xf7   : > { %v614_v39 = vsel %vm611_vm4, %v2842_v34, %v606_v23  ;;  %v639_v40 = vsel %vm637_vm6, %v632_v26, %v2844_v35 }
  0xf8   : > { %v858_v42 = vsel %vm764_vm5, %v639_v40, %v838_v32  ;;  %440 = vrot.lane.b32.xlu1 %v2710_v3, %s2443_s20  ;;  %414 = vrot.lane.b32.xlu0 %v2710_v3, %s2442_s19  ;;  %v853_v46 = vsel %vm764_vm5, %v614_v39, %v825_v41  ;;  %v911_v32 = vld [vmem:[#allocation7 + $0x190] sm:$0xf]  ;;  %v893_v39 = vld [vmem:[#allocation7 + $0x100] sm:$0xff] }
  0xf9   : > { %v958_v44 = vmul.f32 %v906_v37, %v858_v42  ;;  %v953_v54 = vmul.f32 %v901_v49, %v853_v46  ;;  %v897_v40 = vld [vmem:[#allocation7 + $0x120] sm:$0xff] }
  0xfa   : > { %v567_v47 = vpop.permute.xlu1 %566  ;;  %v2861_v48 = vpop.permute.xlu0 %629 }
  0xfb   : > { %v640_v51 = vsel %vm637_vm6, %v2861_v48, %v632_v26  ;;  %v986_v52 = vpack.c.bf16 %v958_v44, %v954_v43 }
  0xfc   : > { %v857_v53 = vsel %vm764_vm5, %v640_v51, %v837_v45  ;;  %371 = vrot.lane.b32.xlu1 %v2658_v2, %s2444_s16  ;;  %369 = vrot.lane.b32.xlu0 %v2650_v1, %s2444_s16 }
  0xfd   : > { %1031 = vmatprep.subr.bf16.mxu0 %v986_v52  ;;  %v957_v55 = vmul.f32 %v905_v50, %v857_v53 }
  0xfe   : > { %v593_v56 = vpop.permute.xlu1 %592  ;;  %v2871_v57 = vpop.permute.xlu0 %568 }
  0xff   : > { %v985_v58 = vpack.c.bf16 %v957_v55, %v953_v54  ;;  %v574_v63 = vsel %vm572_vm7, %v567_v47, %v2871_v57  ;;  %v2448_v54 = vmov 0  }
 0x100   : > { %397 = vrot.lane.b32.xlu1 %v2658_v2, %s2445_s22  ;;  %395 = vrot.lane.b32.xlu0 %v2650_v1, %s2445_s22  ;;  %v802_v12 = vrot.slane %v574_v63, 4 }
 0x101   : > { %1032 = vmatpush1.bf16.msra.mxu0 %v985_v58  ;;  %1059 = vmatprep.mubr.bf16.mxu0 %v2448_v54 }
 0x102   : > { %v2877_v59 = vpop.permute.xlu1 %564  ;;  %v2879_v60 = vpop.permute.xlu0 %594  ;;  %1112 = vmatprep.mubr.bf16.mxu1 %v2448_v54  ;;  %2212 = vset.pattern.permute.xlu1 %v2448_v54 }
 0x103   : > { %v600_v10 = vsel %vm598_vm8, %v593_v56, %v2879_v60  ;;  %v575_v13 = vsel %vm572_vm7, %v2877_v59, %v567_v47  ;;  %2213 = vset.pattern.permute.xlu0 %v2448_v54 }
 0x104   : > { %503 = vrot.lane.b32.xlu1 %v2648_v0, %s2437_s11  ;;  %477 = vrot.lane.b32.xlu0 %v2648_v0, %s2436_s29  ;;  %v814_v14 = vrot.slane %v600_v10, 4  ;;  %v801_v26 = vrot.slane %v575_v13, 4  ;;  %s2344_s29 = sshll.u32 %s2449_s1, 4  ;;  %s2345_s29 = int_to_ptr.vmem [resolvable:$false] %s2344_s29 }
 0x105   : > { %s2346_s11 = scalar_lea.vmem %s2345_s29, 2048 }
 0x106   : > { %v554_v61 = vpop.permute.xlu1 %553  ;;  %v2886_v62 = vpop.permute.xlu0 %590 }
 0x107   : > { %v601_v22 = vsel %vm598_vm8, %v2886_v62, %v593_v56 }
 0x108   : > { %401 = vrot.lane.b32.xlu1 %v2710_v3, %s2445_s22  ;;  %375 = vrot.lane.b32.xlu0 %v2710_v3, %s2444_s16  ;;  %v813_v33 = vrot.slane %v601_v22, 4  ;;  %v890_v22 = vld [vmem:[#allocation7 + $0xe8] sm:$0xff] }
 0x10a   : > { %v580_v6 = vpop.permute.xlu1 %579  ;;  %v2897_v9 = vpop.permute.xlu0 %555 }
 0x10b   : > { %v561_v11 = vsel %vm559_vm9, %v554_v61, %v2897_v9 }
 0x10c   : > { %356 = vrot.lane.b32.xlu1 %v2658_v2, %s2446_s23  ;;  %354 = vrot.lane.b32.xlu0 %v2650_v1, %s2446_s23  ;;  %v846_v15 = vsel %vm764_vm5, %v561_v11, %v802_v12 }
 0x10d   : > { %v946_v29 = vmul.f32 %v894_v20, %v846_v15 }
 0x10e   : > { %v2914_v16 = vpop.permute.xlu1 %551  ;;  %v2916_v17 = vpop.permute.xlu0 %581 }
 0x10f   : > { %v562_v23 = vsel %vm559_vm9, %v2914_v16, %v554_v61  ;;  %v587_v25 = vsel %vm585_vm10, %v580_v6, %v2916_v17 }
 0x110   : > { %v850_v28 = vsel %vm764_vm5, %v587_v25, %v814_v14  ;;  %384 = vrot.lane.b32.xlu1 %v2658_v2, %s2447_s15  ;;  %382 = vrot.lane.b32.xlu0 %v2650_v1, %s2447_s15  ;;  %v845_v36 = vsel %vm764_vm5, %v562_v23, %v801_v26  ;;  %v886_v26 = vld [vmem:[#allocation7 + $0xc8] sm:$0xff] }
 0x111   : > { %v950_v30 = vmul.f32 %v898_v21, %v850_v28 }
 0x112   : > { %v662_v37 = vpop.permute.xlu1 %661  ;;  %v2933_v38 = vpop.permute.xlu0 %577 }
 0x113   : > { %v664_v41 = vsel %vm663_vm0, %v2776_v4, %v662_v37  ;;  %v588_v42 = vsel %vm585_vm10, %v2933_v38, %v580_v6  ;;  %v982_v43 = vpack.c.bf16 %v950_v30, %v946_v29  ;;  %v667_v44 = vsel %vm663_vm0, %v662_v37, %v2778_v5 }
 0x114   : > { %v849_v45 = vsel %vm764_vm5, %v588_v42, %v813_v33  ;;  %490 = vrot.lane.b32.xlu1 %v2648_v0, %s2439_s30  ;;  %464 = vrot.lane.b32.xlu0 %v2648_v0, %s2438_s9  ;;  %v964_v46 = vmul.f32 %v912_v31, %v667_v44  ;;  %v963_v47 = vmul.f32 %v911_v32, %v664_v41  ;;  %v904_v41 = vld [vmem:[#allocation7 + $0x158] sm:$0xff]  ;;  %vm468_vm0 = vcmp.lt.s32.totalorder %v2786_v8, 15 }
 0x115   : > { %1033 = vmatprep.subr.bf16.mxu0 %v982_v43  ;;  %v945_v4 = vmul.f32 %v893_v39, %v845_v36  ;;  %v949_v49 = vmul.f32 %v897_v40, %v849_v45  ;;  %v903_v40 = vld [vmem:[#allocation7 + $0x150] sm:$0xff]  ;;  %v908_v43 = vld [vmem:[#allocation7 + $0x178] sm:$0xff] }
 0x116   : > { %v2949_v50 = vpop.permute.xlu1 %516  ;;  %v515_v51 = vpop.permute.xlu0 %514  ;;  %v992_v52 = vpack.c.bf16 %v964_v46, %v964_v46  ;;  %v991_v53 = vpack.c.bf16 %v963_v47, %v963_v47 }
 0x117   : > { %v981_v5 = vpack.c.bf16 %v949_v49, %v945_v4  ;;  %v522_v6 = vsel %vm520_vm11, %v515_v51, %v2949_v50  ;;  %v907_v4 = vld [vmem:[#allocation7 + $0x170] sm:$0xff] }
 0x118   : > { %388 = vrot.lane.b32.xlu1 %v2710_v3, %s2447_s15  ;;  %1982 = vmatprep.subr.msk.bf16.mxu1 %vm1014_vm1, %v992_v52  ;;  %v1022_v55 = vsel %vm1014_vm1, %v991_v53, 0  ;;  %v745_v10 = vrot.slane %v522_v6, 4  ;;  %vm494_vm1 = vcmp.lt.s32.totalorder %v2786_v8, 2 }
 0x119   : > { %360 = vrot.lane.b32.xlu0 %v2710_v3, %s2446_s23  ;;  %1034 = vmatpush1.bf16.msra.mxu0 %v981_v5 }
 0x11a   : > { %1083 = vmatpush1.bf16.msra.mxu1 %v1022_v55  ;;  %v2961_v56 = vpop.permute.xlu1 %542  ;;  %v541_v58 = vpop.permute.xlu0 %540  ;;  %v790_v25 = vsel %vm764_vm5, %v2658_v2, %v745_v10  ;;  %v885_v10 = vld [vmem:[#allocation7 + $0xc0] sm:$0xff] }
 0x11b   : > { %v548_v13 = vsel %vm546_vm12, %v541_v58, %v2961_v56 }
 0x11c   : > { %451 = vrot.lane.b32.xlu1 %v2648_v0, %s2441_s17  ;;  %v757_v14 = vrot.slane %v548_v13, 4 }
 0x11d   : > { %425 = vrot.lane.b32.xlu0 %v2648_v0, %s2440_s13  ;;  %s1975_s13 = sshll.u32 %s2632_s14, 6 }
 0x11e   : > { %v649_v61 = vpop.permute.xlu1 %648  ;;  %v623_v63 = vpop.permute.xlu0 %622 }
 0x11f   : > { %v651_v15 = vsel %vm650_vm3, %v2805_v19, %v649_v61  ;;  %v654_v20 = vsel %vm650_vm3, %v649_v61, %v2814_v24  ;;  %v625_v28 = vsel %vm624_vm2, %v2784_v7, %v623_v63  ;;  %v628_v19 = vsel %vm624_vm2, %v623_v63, %v2803_v18  ;;  %v889_v63 = vld [vmem:[#allocation7 + $0xe0] sm:$0xff] }
 0x120   : > { %438 = vrot.lane.b32.xlu1 %v2648_v0, %s2443_s20  ;;  %v839_v2 = vrot.slane %v651_v15, 4  ;;  %v840_v31 = vrot.slane %v654_v20, 4  ;;  %v938_v18 = vmul.f32 %v886_v26, %v790_v25  ;;  %v827_v32 = vrot.slane %v625_v28, 4  ;;  %s2014_s20 = sshll.u32 %s2512_s28, 10 }
 0x121   : > { %412 = vrot.lane.b32.xlu0 %v2648_v0, %s2442_s19  ;;  %v828_v33 = vrot.slane %v628_v19, 4  ;;  %vm429_vm2 = vcmp.lt.s32.totalorder %v2786_v8, 18  ;;  %vm455_vm3 = vcmp.lt.s32.totalorder %v2786_v8, 16  ;;  %s3591_s19 = scalar_lea.vmem [#allocation10], %s1975_s13 }
 0x122   : > { %v2976_v11 = vpop.permute.xlu1 %538  ;;  %v2978_v12 = vpop.permute.xlu0 %512 }
 0x123   : > { %v523_v24 = vsel %vm520_vm11, %v2978_v12, %v515_v51  ;;  %v549_v36 = vsel %vm546_vm12, %v2976_v11, %v541_v58 }
 0x124   : > { %399 = vrot.lane.b32.xlu1 %v2648_v0, %s2445_s22  ;;  %v744_v37 = vrot.slane %v523_v24, 4  ;;  %v756_v58 = vrot.slane %v549_v36, 4 }
 0x125   : > { %373 = vrot.lane.b32.xlu0 %v2648_v0, %s2444_s16  ;;  %s1858_s16 = sshll.u32 %s3591_s19, 4  ;;  %s3624_s16 = int_to_ptr.vmem [resolvable:$true] %s1858_s16 }
 0x126   : > { %v2994_v21 = vpop.permute.xlu1 %529  ;;  %v528_v23 = vpop.permute.xlu0 %527  ;;  %s2340_s10 = scalar_lea.vmem %s3624_s16, 1024  ;;  %p2347_p1 = scmp.lt.s32.totalorder %s3624_s16, %s2345_s29 }
 0x127   : > { %v535_v29 = vsel %vm533_vm13, %v528_v23, %v2994_v21  ;;  %p2341_p12 = scmp.ne.s32.totalorder %s3624_s16, %s2340_s10  ;;  %p2348_p3 = scmp.lt.s32.totalorder %s2346_s11, %s2340_s10 }
 0x128   : > { %v794_v30 = vsel %vm764_vm5, %v535_v29, %v757_v14  ;;  %386 = vrot.lane.b32.xlu1 %v2648_v0, %s2447_s15  ;;  %s1844_s15 = scalar_lea.sflag [#allocation4], %s2632_s14 }
 0x129   : > { %v942_v7 = vmul.f32 %v890_v22, %v794_v30  ;;  %358 = vrot.lane.b32.xlu0 %v2648_v0, %s2446_s23  ;;  %s3622_s23 = scalar_lea.hbm %s3679_s7, %s2014_s20  ;;  %p2342_p5 = pnand %p2341_p12, %p3703_p0 }
 0x12a   : > { %v636_v39 = vpop.permute.xlu1 %635  ;;  %v610_v42 = vpop.permute.xlu0 %609  ;;  %p2349_p6 = por %p2348_p3, %p2347_p1 }
 0x12b   : > { %v638_v44 = vsel %vm637_vm6, %v2844_v35, %v636_v39  ;;  %v641_v45 = vsel %vm637_vm6, %v636_v39, %v2861_v48  ;;  %v612_v46 = vsel %vm611_vm4, %v2825_v27, %v610_v42  ;;  %v615_v47 = vsel %vm611_vm4, %v610_v42, %v2842_v34  ;;  %v878_v42 = vld [vmem:[#allocation7 + $0x88] sm:$0xff]  ;;  %p2343_p10 = pneg %p2342_p5 }
 0x12c   : > { %v859_v49 = vsel %vm764_vm5, %v638_v44, %v839_v2  ;;  %v860_v51 = vsel %vm764_vm5, %v641_v45, %v840_v31  ;;  %v855_v52 = vsel %vm764_vm5, %v612_v46, %v827_v32  ;;  %v856_v35 = vsel %vm764_vm5, %v615_v47, %v828_v33  ;;  %v882_v45 = vld [vmem:[#allocation7 + $0xa8] sm:$0xff] }
 0x12d   : > { %v955_v53 = vmul.f32 %v903_v40, %v855_v52  ;;  %v956_v5 = vmul.f32 %v904_v41, %v856_v35  ;;  %v978_v48 = vpack.c.bf16 %v942_v7, %v938_v18  ;;  %v960_v55 = vmul.f32 %v908_v43, %v860_v51  ;;  %p2350_p9 = pnand %p2349_p6, %p2343_p10 }
 0x12e   : > { %v789_v27 = vsel %vm764_vm5, %v2650_v1, %v744_v37  ;;  %v474_v61 = vpop.permute.xlu1 %473  ;;  %v3036_v34 = vpop.permute.xlu0 %525  ;;  %v959_v6 = vmul.f32 %v907_v4, %v859_v49  ;;  %vm416_vm4 = vcmp.lt.s32.totalorder %v2786_v8, 30  ;;  %vm442_vm6 = vcmp.lt.s32.totalorder %v2786_v8, 17 }
 0x12f   : > { %1035 = vmatprep.subr.bf16.mxu0 %v978_v48  ;;  %v536_v13 = vsel %vm533_vm13, %v3036_v34, %v528_v23  ;;  %v988_v14 = vpack.c.bf16 %v960_v55, %v956_v5  ;;  %v937_v25 = vmul.f32 %v885_v10, %v789_v27  ;;  %v896_v48 = vld [vmem:[#allocation7 + $0x118] sm:$0xff] }
 0x130   : > { %v793_v15 = vsel %vm764_vm5, %v536_v13, %v756_v58  ;;  %v987_v20 = vpack.c.bf16 %v959_v6, %v955_v53  ;;  %v895_v53 = vld [vmem:[#allocation7 + $0x110] sm:$0xff]  ;;  %v900_v6 = vld [vmem:[#allocation7 + $0x138] sm:$0xff] }
 0x131   : > { %v941_v22 = vmul.f32 %v889_v63, %v793_v15  ;;  %1084 = vmatprep.subr.bf16.mxu1 %v988_v14  ;;  %v899_v63 = vld [vmem:[#allocation7 + $0x130] sm:$0xff] }
 0x132   : > { %v500_v26 = vpop.permute.xlu1 %499  ;;  %1085 = vmatpush1.bf16.msra.mxu1 %v987_v20  ;;  %v3042_v1 = vpop.permute.xlu0 %475 }
 0x133   : > { %v977_v28 = vpack.c.bf16 %v941_v22, %v937_v25  ;;  %v484_v31 = vsel %vm481_vm14, %v474_v61, %v3042_v1 }
 0x134   : > { %v721_v36 = vrot.slane %v484_v31, 4  ;;  %v877_v31 = vld [vmem:[#allocation7 + $0x80] sm:$0xff] }
 0x135   : > { %1036 = vmatpush1.bf16.msra.mxu0 %v977_v28 }
 0x136   : > { %v571_v19 = vpop.permute.xlu1 %570  ;;  %v3044_v24 = vpop.permute.xlu0 %501 }
 0x137   : > { %v510_v32 = vsel %vm507_vm15, %v500_v26, %v3044_v24  ;;  %v573_v37 = vsel %vm572_vm7, %v2871_v57, %v571_v19  ;;  %v576_v39 = vsel %vm572_vm7, %v571_v19, %v2877_v59  ;;  %vm377_vm7 = vcmp.lt.s32.totalorder %v2786_v8, 33 }
 0x138   : > { %v733_v40 = vrot.slane %v510_v32, 4  ;;  %v803_v4 = vrot.slane %v573_v37, 4  ;;  %v804_v49 = vrot.slane %v576_v39, 4 }
 0x13a   : > { %v3046_v29 = vpop.permute.xlu1 %479  ;;  %v597_v30 = vpop.permute.xlu0 %596 }
 0x13b   : > { %v599_v41 = vsel %vm598_vm8, %v2879_v60, %v597_v30  ;;  %v602_v57 = vsel %vm598_vm8, %v597_v30, %v2886_v62  ;;  %v485_v62 = vsel %vm481_vm14, %v3046_v29, %v474_v61  ;;  %vm403_vm8 = vcmp.lt.s32.totalorder %v2786_v8, 31 }
 0x13c   : > { %v815_v52 = vrot.slane %v599_v41, 4  ;;  %v816_v5 = vrot.slane %v602_v57, 4  ;;  %v720_v20 = vrot.slane %v485_v62, 4 }
 0x13e   : > { %v461_v23 = vpop.permute.xlu1 %460  ;;  %v3049_v2 = vpop.permute.xlu0 %505 }
 0x142   : > { %v487_v7 = vpop.permute.xlu1 %486  ;;  %v3056_v18 = vpop.permute.xlu0 %462 }
 0x143   : > { %v471_v33 = vsel %vm468_vm0, %v461_v23, %v3056_v18 }
 0x144   : > { %v782_v43 = vsel %vm764_vm5, %v471_v33, %v721_v36  ;;  %v881_v33 = vld [vmem:[#allocation7 + $0xa0] sm:$0xff] }
 0x145   : > { %v930_v35 = vmul.f32 %v878_v42, %v782_v43 }
 0x146   : > { %v558_v44 = vpop.permute.xlu1 %557  ;;  %v3075_v46 = vpop.permute.xlu0 %488 }
 0x147   : > { %v560_v59 = vsel %vm559_vm9, %v2897_v9, %v558_v44  ;;  %v563_v47 = vsel %vm559_vm9, %v558_v44, %v2914_v16  ;;  %v497_v60 = vsel %vm494_vm1, %v487_v7, %v3075_v46  ;;  %v511_v16 = vsel %vm507_vm15, %v3049_v2, %v500_v26 }
 0x148   : > { %v786_v51 = vsel %vm764_vm5, %v497_v60, %v733_v40  ;;  %v847_v55 = vsel %vm764_vm5, %v560_v59, %v803_v4  ;;  %v848_v58 = vsel %vm764_vm5, %v563_v47, %v804_v49  ;;  %vm364_vm9 = vcmp.lt.s32.totalorder %v2786_v8, 34 }
 0x149   : > { %v934_v9 = vmul.f32 %v882_v45, %v786_v51  ;;  %v947_v26 = vmul.f32 %v895_v53, %v847_v55  ;;  %v948_v28 = vmul.f32 %v896_v48, %v848_v58 }
 0x14a   : > { %v3098_v27 = vpop.permute.xlu1 %466  ;;  %v584_v10 = vpop.permute.xlu0 %583 }
 0x14b   : > { %v472_v61 = vsel %vm468_vm0, %v3098_v27, %v461_v23  ;;  %v586_v13 = vsel %vm585_vm10, %v2916_v17, %v584_v10  ;;  %v589_v14 = vsel %vm585_vm10, %v584_v10, %v2933_v38  ;;  %v974_v15 = vpack.c.bf16 %v934_v9, %v930_v35 }
 0x14c   : > { %v851_v22 = vsel %vm764_vm5, %v586_v13, %v815_v52  ;;  %v852_v25 = vsel %vm764_vm5, %v589_v14, %v816_v5  ;;  %v732_v23 = vrot.slane %v511_v16, 4  ;;  %v781_v32 = vsel %vm764_vm5, %v472_v61, %v720_v20  ;;  %v891_v14 = vld [vmem:[#allocation7 + $0xf0] sm:$0xff] }
 0x14d   : > { %v951_v19 = vmul.f32 %v899_v63, %v851_v22  ;;  %v952_v30 = vmul.f32 %v900_v6, %v852_v25  ;;  %1037 = vmatprep.subr.bf16.mxu0 %v974_v15  ;;  %v929_v41 = vmul.f32 %v877_v31, %v781_v32  ;;  %v870_v6 = vld [vmem:[#allocation7 + $0x48] sm:$0xff]  ;;  %v892_v15 = vld [vmem:[#allocation7 + $0xf8] sm:$0xff]  ;;  %vm390_vm10 = vcmp.lt.s32.totalorder %v2786_v8, 32 }
 0x14e   : > { %v422_v17 = vpop.permute.xlu1 %421  ;;  %v3112_v36 = vpop.permute.xlu0 %492  ;;  %v874_v22 = vld [vmem:[#allocation7 + $0x68] sm:$0xff] }
 0x14f   : > { %v498_v38 = vsel %vm494_vm1, %v3112_v36, %v487_v7  ;;  %v984_v37 = vpack.c.bf16 %v952_v30, %v948_v28  ;;  %v983_v39 = vpack.c.bf16 %v951_v19, %v947_v26  ;;  %v887_v19 = vld [vmem:[#allocation7 + $0xd0] sm:$0xff] }
 0x150   : > { %v785_v40 = vsel %vm764_vm5, %v498_v38, %v732_v23 }
 0x151   : > { %v933_v42 = vmul.f32 %v881_v33, %v785_v40  ;;  %1086 = vmatprep.subr.bf16.mxu1 %v984_v37  ;;  %v873_v40 = vld [vmem:[#allocation7 + $0x60] sm:$0xff] }
 0x152   : > { %v448_v43 = vpop.permute.xlu1 %447  ;;  %1087 = vmatpush1.bf16.msra.mxu1 %v983_v39  ;;  %v3118_v44 = vpop.permute.xlu0 %423 }
 0x153   : > { %v973_v45 = vpack.c.bf16 %v933_v42, %v929_v41  ;;  %v432_v62 = vsel %vm429_vm2, %v422_v17, %v3118_v44  ;;  %v869_v41 = vld [vmem:[#allocation7 + $0x40] sm:$0xff] }
 0x154   : > { %v697_v48 = vrot.slane %v432_v62, 4 }
 0x155   : > { %1038 = vmatpush1.bf16.msra.mxu0 %v973_v45 }
 0x156   : > { %v519_v57 = vpop.permute.xlu1 %518  ;;  %v3120_v59 = vpop.permute.xlu0 %449 }
 0x157   : > { %v521_v7 = vsel %vm520_vm11, %v2949_v50, %v519_v57  ;;  %v524_v4 = vsel %vm520_vm11, %v519_v57, %v2978_v12  ;;  %v458_v50 = vsel %vm455_vm3, %v448_v43, %v3120_v59  ;;  %vm1007_vm11 = vcmask 818176  }
 0x158   : > { %v746_v52 = vrot.slane %v521_v7, 4  ;;  %v747_v35 = vrot.slane %v524_v4, 4  ;;  %v709_v63 = vrot.slane %v458_v50, 4 }
 0x15a   : > { %v3122_v47 = vpop.permute.xlu1 %427  ;;  %v545_v60 = vpop.permute.xlu0 %544  ;;  %v791_v55 = vsel %vm764_vm5, %v2648_v0, %v746_v52  ;;  %v792_v58 = vsel %vm764_vm5, %v2710_v3, %v747_v35 }
 0x15b   : > { %v547_v12 = vsel %vm546_vm12, %v2961_v56, %v545_v60  ;;  %v550_v5 = vsel %vm546_vm12, %v545_v60, %v2976_v11  ;;  %v888_v56 = vld [vmem:[#allocation7 + $0xd8] sm:$0xff]  ;;  %v433_v11 = vsel %vm429_vm2, %v3122_v47, %v422_v17 }
 0x15c   : > { %v758_v10 = vrot.slane %v547_v12, 4  ;;  %v759_v61 = vrot.slane %v550_v5, 4  ;;  %v940_v32 = vmul.f32 %v888_v56, %v792_v58  ;;  %v696_v37 = vrot.slane %v433_v11, 4 }
 0x15e   : > { %v409_v49 = vpop.permute.xlu1 %408  ;;  %v3131_v51 = vpop.permute.xlu0 %453 }
 0x15f   : > { %v459_v0 = vsel %vm455_vm3, %v3131_v51, %v448_v43  ;;  %v939_v43 = vmul.f32 %v887_v19, %v791_v55 }
 0x160   : > { %v708_v39 = vrot.slane %v459_v0, 4 }
 0x162   : > { %v435_v53 = vpop.permute.xlu1 %434  ;;  %v3141_v9 = vpop.permute.xlu0 %410 }
 0x163   : > { %v419_v16 = vsel %vm416_vm4, %v409_v49, %v3141_v9 }
 0x164   : > { %v774_v13 = vsel %vm764_vm5, %v419_v16, %v697_v48 }
 0x165   : > { %v922_v17 = vmul.f32 %v870_v6, %v774_v13 }
 0x166   : > { %v532_v20 = vpop.permute.xlu1 %531  ;;  %v3161_v25 = vpop.permute.xlu0 %436 }
 0x167   : > { %v534_v3 = vsel %vm533_vm13, %v2994_v21, %v532_v20  ;;  %v537_v26 = vsel %vm533_vm13, %v532_v20, %v3036_v34  ;;  %v445_v28 = vsel %vm442_vm6, %v435_v53, %v3161_v25 }
 0x168   : > { %v795_v30 = vsel %vm764_vm5, %v534_v3, %v758_v10  ;;  %v796_v23 = vsel %vm764_vm5, %v537_v26, %v759_v61  ;;  %v778_v31 = vsel %vm764_vm5, %v445_v28, %v709_v63  ;;  %v862_v3 = vld [vmem:[#allocation7 + $0x8] sm:$0xff] }
 0x169   : > { %v943_v33 = vmul.f32 %v891_v14, %v795_v30  ;;  %v944_v38 = vmul.f32 %v892_v15, %v796_v23  ;;  %v926_v21 = vmul.f32 %v874_v22, %v778_v31  ;;  %v866_v28 = vld [vmem:[#allocation7 + $0x28] sm:$0xff] }
 0x16a   : > { %v3178_v34 = vpop.permute.xlu1 %440  ;;  %v3180_v42 = vpop.permute.xlu0 %414 }
 0x16b   : > { %v446_v45 = vsel %vm442_vm6, %v3178_v34, %v435_v53  ;;  %v420_v57 = vsel %vm416_vm4, %v3180_v42, %v409_v49  ;;  %v970_v60 = vpack.c.bf16 %v926_v21, %v922_v17  ;;  %v980_v7 = vpack.c.bf16 %v944_v38, %v940_v32  ;;  %v883_v17 = vld [vmem:[#allocation7 + $0xb0] sm:$0xff] }
 0x16c   : > { %v777_v4 = vsel %vm764_vm5, %v446_v45, %v708_v39  ;;  %v773_v62 = vsel %vm764_vm5, %v420_v57, %v696_v37  ;;  %v979_v52 = vpack.c.bf16 %v943_v33, %v939_v43  ;;  %v884_v37 = vld [vmem:[#allocation7 + $0xb8] sm:$0xff] }
 0x16d   : > { %v925_v35 = vmul.f32 %v873_v40, %v777_v4  ;;  %v921_v50 = vmul.f32 %v869_v41, %v773_v62  ;;  %1039 = vmatprep.subr.bf16.mxu0 %v970_v60  ;;  %1088 = vmatprep.subr.bf16.mxu1 %v980_v7  ;;  %v879_v40 = vld [vmem:[#allocation7 + $0x90] sm:$0xff]  ;;  %v880_v41 = vld [vmem:[#allocation7 + $0x98] sm:$0xff] }
 0x16e   : > { %v3190_v12 = vpop.permute.xlu1 %371  ;;  %1089 = vmatpush1.bf16.msra.mxu1 %v979_v52  ;;  %v370_v5 = vpop.permute.xlu0 %369 }
 0x16f   : > { %v969_v53 = vpack.c.bf16 %v925_v35, %v921_v50  ;;  %v380_v11 = vsel %vm377_vm7, %v370_v5, %v3190_v12 }
 0x170   : > { %v673_v13 = vrot.slane %v380_v11, 4 }
 0x171   : > { %1040 = vmatpush1.bf16.msra.mxu0 %v969_v53 }
 0x172   : > { %v3192_v16 = vpop.permute.xlu1 %397  ;;  %v396_v49 = vpop.permute.xlu0 %395 }
 0x176   : > { %v504_v48 = vpop.permute.xlu1 %503  ;;  %v478_v55 = vpop.permute.xlu0 %477 }
 0x177   : > { %v508_v58 = vsel %vm507_vm15, %v504_v48, %v3049_v2  ;;  %v509_v63 = vsel %vm507_vm15, %v3044_v24, %v504_v48  ;;  %v406_v24 = vsel %vm403_vm8, %v396_v49, %v3192_v16  ;;  %v482_v15 = vsel %vm481_vm14, %v478_v55, %v3046_v29  ;;  %v865_v48 = vld [vmem:[#allocation7 + $0x20] sm:$0xff] }
 0x178   : > { %v685_v14 = vrot.slane %v406_v24, 4  ;;  %v483_v20 = vsel %vm481_vm14, %v3042_v1, %v478_v55  ;;  %v734_v23 = vrot.slane %v509_v63, 4  ;;  %v735_v31 = vrot.slane %v508_v58, 4  ;;  %v861_v58 = vld [vmem:[#allocation7] sm:$0xff] }
 0x179   : > { %v722_v29 = vrot.slane %v483_v20, 4  ;;  %v723_v32 = vrot.slane %v482_v15, 4 }
 0x17a   : > { %v3200_v6 = vpop.permute.xlu1 %401  ;;  %v3202_v56 = vpop.permute.xlu0 %375 }
 0x17b   : > { %v407_v1 = vsel %vm403_vm8, %v3200_v6, %v396_v49  ;;  %v381_v33 = vsel %vm377_vm7, %v3202_v56, %v370_v5 }
 0x17c   : > { %v684_v53 = vrot.slane %v407_v1, 4  ;;  %v672_v55 = vrot.slane %v381_v33, 4 }
 0x17e   : > { %v3210_v10 = vpop.permute.xlu1 %356  ;;  %v355_v2 = vpop.permute.xlu0 %354 }
 0x17f   : > { %v367_v61 = vsel %vm364_vm9, %v355_v2, %v3210_v10 }
 0x180   : > { %v766_v26 = vsel %vm764_vm5, %v367_v61, %v673_v13 }
 0x181   : > { %v914_v38 = vmul.f32 %v862_v3, %v766_v26 }
 0x182   : > { %v3225_v22 = vpop.permute.xlu1 %384  ;;  %v383_v0 = vpop.permute.xlu0 %382 }
 0x183   : > { %v393_v19 = vsel %vm390_vm10, %v383_v0, %v3225_v22 }
 0x184   : > { %v770_v30 = vsel %vm764_vm5, %v393_v19, %v685_v14 }
 0x185   : > { %v918_v21 = vmul.f32 %v866_v28, %v770_v30 }
 0x186   : > { %v491_v39 = vpop.permute.xlu1 %490  ;;  %v465_v43 = vpop.permute.xlu0 %464 }
 0x187   : > { %v495_v45 = vsel %vm494_vm1, %v491_v39, %v3112_v36  ;;  %v496_v57 = vsel %vm494_vm1, %v3075_v46, %v491_v39  ;;  %v469_v60 = vsel %vm468_vm0, %v465_v43, %v3098_v27  ;;  %v470_v7 = vsel %vm468_vm0, %v3056_v18, %v465_v43 }
 0x188   : > { %v787_v4 = vsel %vm764_vm5, %v496_v57, %v734_v23  ;;  %v788_v62 = vsel %vm764_vm5, %v495_v45, %v735_v31  ;;  %v783_v52 = vsel %vm764_vm5, %v470_v7, %v722_v29  ;;  %v784_v36 = vsel %vm764_vm5, %v469_v60, %v723_v32  ;;  %v875_v29 = vld [vmem:[#allocation7 + $0x70] sm:$0xff]  ;;  %v876_v32 = vld [vmem:[#allocation7 + $0x78] sm:$0xff] }
 0x189   : > { %v935_v35 = vmul.f32 %v883_v17, %v787_v4  ;;  %v936_v50 = vmul.f32 %v884_v37, %v788_v62  ;;  %v931_v5 = vmul.f32 %v879_v40, %v783_v52  ;;  %v932_v46 = vmul.f32 %v880_v41, %v784_v36 }
 0x18a   : > { %v966_v49 = vpack.c.bf16 %v918_v21, %v914_v38  ;;  %v3254_v27 = vpop.permute.xlu1 %388  ;;  %v872_v38 = vld [vmem:[#allocation7 + $0x58] sm:$0xff] }
 0x18b   : > { %v394_v18 = vsel %vm390_vm10, %v3254_v27, %v383_v0  ;;  %v3259_v63 = vpop.permute.xlu0 %360  ;;  %v976_v11 = vpack.c.bf16 %v936_v50, %v932_v46  ;;  %v975_v24 = vpack.c.bf16 %v935_v35, %v931_v5  ;;  %v868_v46 = vld [vmem:[#allocation7 + $0x38] sm:$0xff] }
 0x18c   : > { %1041 = vmatprep.subr.bf16.mxu0 %v966_v49  ;;  %v769_v61 = vsel %vm764_vm5, %v394_v18, %v684_v53  ;;  %v368_v13 = vsel %vm364_vm9, %v3259_v63, %v355_v2  ;;  %v2217_v49 = vld [vmem:[#allocation5 + $0x8] sm:$0xff]  }
 0x18d   : > { %v917_v14 = vmul.f32 %v865_v48, %v769_v61  ;;  %v765_v15 = vsel %vm764_vm5, %v368_v13, %v672_v55  ;;  %1090 = vmatprep.subr.bf16.mxu1 %v976_v11  ;;  %v864_v18 = vld [vmem:[#allocation7 + $0x18] sm:$0xff] }
 0x18e   : > { %v913_v20 = vmul.f32 %v861_v58, %v765_v15  ;;  %v452_v3 = vpop.permute.xlu1 %451  ;;  %1091 = vmatpush1.bf16.msra.mxu1 %v975_v24 }
 0x18f   : > { %v456_v0 = vsel %vm455_vm3, %v452_v3, %v3131_v51  ;;  %v457_v26 = vsel %vm455_vm3, %v3120_v59, %v452_v3  ;;  %v426_v28 = vpop.permute.xlu0 %425  ;;  %v2216_v51 = vld [vmem:[#allocation5] sm:$0xff]  }
 0x190   : > { %v430_v2 = vsel %vm429_vm2, %v426_v28, %v3122_v47  ;;  %v431_v19 = vsel %vm429_vm2, %v3118_v44, %v426_v28  ;;  %v965_v30 = vpack.c.bf16 %v917_v14, %v913_v20  ;;  %v710_v23 = vrot.slane %v457_v26, 4  ;;  %v871_v44 = vld [vmem:[#allocation7 + $0x50] sm:$0xff] }
 0x191   : > { %v711_v31 = vrot.slane %v456_v0, 4  ;;  %v698_v1 = vrot.slane %v431_v19, 4  ;;  %v699_v33 = vrot.slane %v430_v2, 4  ;;  %v1149_v19 = vld [vmem:[%s3675_s3 + $0x20] sm:$0xff] }
 0x192   : > { %v439_v17 = vpop.permute.xlu1 %438  ;;  %1042 = vmatpush1.bf16.msra.mxu0 %v965_v30  ;;  %v1150_v30 = vld [vmem:[%s3675_s3 + $0x28] sm:$0xff] }
 0x193   : > { %v443_v59 = vsel %vm442_vm6, %v439_v17, %v3178_v34  ;;  %v444_v47 = vsel %vm442_vm6, %v3161_v25, %v439_v17  ;;  %v413_v21 = vpop.permute.xlu0 %412  ;;  %v1152_v17 = vld [vmem:[%s3675_s3 + $0x38] sm:$0xff] }
 0x194   : > { %v779_v37 = vsel %vm764_vm5, %v444_v47, %v710_v23  ;;  %v780_v39 = vsel %vm764_vm5, %v443_v59, %v711_v31  ;;  %v417_v40 = vsel %vm416_vm4, %v413_v21, %v3180_v42  ;;  %v418_v41 = vsel %vm416_vm4, %v3141_v9, %v413_v21 }
 0x195   : > { %v927_v34 = vmul.f32 %v875_v29, %v779_v37  ;;  %v928_v43 = vmul.f32 %v876_v32, %v780_v39  ;;  %v775_v45 = vsel %vm764_vm5, %v418_v41, %v698_v1  ;;  %v776_v25 = vsel %vm764_vm5, %v417_v40, %v699_v33  ;;  %1980 = vmatmul.mubr.msk.bf16.vlgmr.msra.gmra.mxu0 %vm1007_vm11, %v2216_v51  ;;  %v1151_v32 = vld [vmem:[%s3675_s3 + $0x30] sm:$0xff]  ;;  %v1148_v1 = vld [vmem:[%s3675_s3 + $0x18] sm:$0xff]  ;;  %v1146_v39 = vld [vmem:[%s3675_s3 + $0x8] sm:$0xff] }
 0x196   : > { %v923_v57 = vmul.f32 %v871_v44, %v775_v45  ;;  %v924_v60 = vmul.f32 %v872_v38, %v776_v25  ;;  %v400_v7 = vpop.permute.xlu1 %399  ;;  %1069 = vmatprep.mubr.bf16.mxu0 %v2448_v54  ;;  %v1147_v44 = vld [vmem:[%s3675_s3 + $0x10] sm:$0xff] }
 0x197   : > { %v404_v4 = vsel %vm403_vm8, %v400_v7, %v3200_v6  ;;  %v405_v42 = vsel %vm403_vm8, %v3192_v16, %v400_v7  ;;  %v374_v9 = vpop.permute.xlu0 %373  ;;  %v867_v6 = vld [vmem:[#allocation7 + $0x30] sm:$0xff] }
 0x198   : > { %v378_v62 = vsel %vm377_vm7, %v374_v9, %v3202_v56  ;;  %v379_v52 = vsel %vm377_vm7, %v3190_v12, %v374_v9  ;;  %v972_v36 = vpack.c.bf16 %v928_v43, %v924_v60  ;;  %v971_v35 = vpack.c.bf16 %v927_v34, %v923_v57  ;;  %v863_v12 = vld [vmem:[#allocation7 + $0x10] sm:$0xff] }
 0x199   : > { %v686_v50 = vrot.slane %v405_v42, 4  ;;  %v687_v5 = vrot.slane %v404_v4, 4  ;;  %v674_v16 = vrot.slane %v379_v52, 4  ;;  %v675_v48 = vrot.slane %v378_v62, 4  ;;  %v1145_v34 = vld [vmem:[%s3675_s3] sm:$0xff] }
 0x19a   : > { %v387_v53 = vpop.permute.xlu1 %386  ;;  %1092 = vmatprep.subr.bf16.mxu1 %v972_v36 }
 0x19b   : > { %v391_v55 = vsel %vm390_vm10, %v387_v53, %v3254_v27  ;;  %v392_v56 = vsel %vm390_vm10, %v3225_v22, %v387_v53  ;;  %v359_v58 = vpop.permute.xlu0 %358  ;;  %1093 = vmatpush1.bf16.msra.mxu1 %v971_v35 }
 0x19c   : > { %v771_v11 = vsel %vm764_vm5, %v392_v56, %v686_v50  ;;  %v772_v24 = vsel %vm764_vm5, %v391_v55, %v687_v5  ;;  %v365_v61 = vsel %vm364_vm9, %v359_v58, %v3259_v63  ;;  %v366_v27 = vsel %vm364_vm9, %v3210_v10, %v359_v58  ;;  %v3400_v56 = vld [vmem:[#allocation8] sm:$0xff] }
 0x19d   : > { %v919_v13 = vmul.f32 %v867_v6, %v771_v11  ;;  %v920_v14 = vmul.f32 %v868_v46, %v772_v24  ;;  %v767_v22 = vsel %vm764_vm5, %v366_v27, %v674_v16  ;;  %v768_v15 = vsel %vm764_vm5, %v365_v61, %v675_v48  ;;  %1981 = vmatmul.mubr.msk.bf16.gmra.mxu0 %vm1007_vm11, %v2217_v49  ;;  %v3406_v24 = vld [vmem:[#allocation8 + $0x8] sm:$0xff]  ;;  %v3408_v61 = vld [vmem:[#allocation8 + $0x10] sm:$0xff]  ;;  %v3414_v27 = vld [vmem:[#allocation8 + $0x18] sm:$0xff] }
 0x19e   : > { %v915_v20 = vmul.f32 %v863_v12, %v767_v22  ;;  %v916_v3 = vmul.f32 %v864_v18, %v768_v15  ;;  %vm1173_vm5 = vcmask 261120  }
 0x19f   : > { %2055 = vmatprep.mubr.msk.f32.mxu0 %vm1173_vm5, %v3400_v56 }
 0x1a0   : > { %v968_v0 = vpack.c.bf16 %v920_v14, %v916_v3  ;;  %v967_v26 = vpack.c.bf16 %v919_v13, %v915_v20 }
 0x1a2   : > { %1094 = vmatprep.subr.bf16.mxu1 %v968_v0 }
 0x1a3   : > { %1095 = vmatpush1.bf16.msra.mxu1 %v967_v26 }
 0x1a6   : > { %1983 = vmatmul.mubr.msk.bf16.vlgmr.msra.gmra.mxu1 %vm1007_vm11, %v2216_v51 }
 0x1a7   : > { %1122 = vmatprep.mubr.bf16.mxu1 %v2448_v54 }
 0x1ae   : > { %1984 = vmatmul.mubr.msk.bf16.gmra.mxu1 %vm1007_vm11, %v2217_v49 }
 0x1af   : > { %2069 = vmatprep.mubr.msk.f32.mxu1 %vm1173_vm5, %v3400_v56 }
 0x255   : > { %v1061_v8 = vpop.f32.mrf.mxu0 }
 0x256   : > { %v3372_v60 = vadd.f32 %v1145_v34, %v1061_v8 }
 0x257   : > { %v1063_v10 = vpop.f32.mrf.mxu0 }
 0x258   : > { %v3368_v45 = vadd.f32 %v1146_v39, %v1063_v10 }
 0x259   : > { %v1065_v63 = vpop.f32.mrf.mxu0 }
 0x25a   : > { %v3363_v41 = vadd.f32 %v1147_v44, %v1065_v63  ;;  %v1161_v4 = vadd.f32 %v3368_v45, %v3372_v60 }
 0x25b   : > { %v1067_v28 = vpop.f32.mrf.mxu0 }
 0x25c   : > { %v3356_v21 = vadd.f32 %v1148_v1, %v1067_v28 }
 0x25d   : > { %v1071_v2 = vpop.f32.mrf.mxu0 }
 0x25e   : > { %v3334_v31 = vadd.f32 %v1149_v19, %v1071_v2  ;;  %v1164_v25 = vadd.f32 %v3356_v21, %v3363_v41 }
 0x25f   : > { %v1073_v23 = vpop.f32.mrf.mxu0 }
 0x260   : > { %v3336_v29 = vadd.f32 %v1150_v30, %v1073_v23 }
 0x261   : > { %v1075_v54 = vpop.f32.mrf.mxu0 }
 0x262   : > { %v1167_v51 = vadd.f32 %v3336_v29, %v3334_v31  ;;  %v3349_v59 = vadd.f32 %v1151_v32, %v1075_v54 }
 0x263   : > { %v1077_v33 = vpop.f32.mrf.mxu0 }
 0x264   : > { %v3351_v47 = vadd.f32 %v1152_v17, %v1077_v33  ;;  %1168 = vadd.xlane.f32.xlu1 %v1167_v51 }
 0x266   : > { %v1114_v38 = vpop.f32.mrf.mxu1  ;;  %v1170_v37 = vadd.f32 %v3351_v47, %v3349_v59 }
 0x267   : > { %v3380_v36 = vadd.f32 %v1145_v34, %v1114_v38 }
 0x268   : > { %v1116_v40 = vpop.f32.mrf.mxu1  ;;  %1171 = vadd.xlane.f32.xlu0 %v1170_v37 }
 0x269   : > { %v3382_v35 = vadd.f32 %v1146_v39, %v1116_v40 }
 0x26a   : > { %v1118_v43 = vpop.f32.mrf.mxu1 }
 0x26b   : > { %v1532_v53 = vadd.f32 %v3382_v35, %v3380_v36  ;;  %v3396_v48 = vadd.f32 %v1147_v44, %v1118_v43 }
 0x26c   : > { %v1120_v57 = vpop.f32.mrf.mxu1  ;;  %1165 = vadd.xlane.f32.xlu0 %v1164_v25 }
 0x26d   : > { %v3392_v49 = vadd.f32 %v1148_v1, %v1120_v57 }
 0x26e   : > { %v1124_v7 = vpop.f32.mrf.mxu1 }
 0x26f   : > { %v3376_v42 = vadd.f32 %v1149_v19, %v1124_v7  ;;  %v1535_v55 = vadd.f32 %v3392_v49, %v3396_v48 }
 0x270   : > { %v1126_v9 = vpop.f32.mrf.mxu1  ;;  %1162 = vadd.xlane.f32.xlu0 %v1161_v4 }
 0x271   : > { %v3378_v62 = vadd.f32 %v1150_v30, %v1126_v9 }
 0x272   : > { %v1128_v52 = vpop.f32.mrf.mxu1 }
 0x273   : > { %v1538_v50 = vadd.f32 %v3378_v62, %v3376_v42  ;;  %v3386_v6 = vadd.f32 %v1151_v32, %v1128_v52 }
 0x274   : > { %v1130_v5 = vpop.f32.mrf.mxu1 }
 0x275   : > { %v3388_v46 = vadd.f32 %v1152_v17, %v1130_v5  ;;  %1539 = vadd.xlane.f32.xlu0 %v1538_v50 }
 0x277   : > { %v1541_v16 = vadd.f32 %v3388_v46, %v3386_v6 }
 0x279   : > { %1533 = vadd.xlane.f32.xlu0 %v1532_v53  ;;  %1542 = vadd.xlane.f32.xlu1 %v1541_v16 }
 0x27d   : > { %1536 = vadd.xlane.f32.xlu1 %v1535_v55 }
 0x2ed   : > { %v1169_v18 = vpop.xlane.xlu1 %1168 }
 0x2f1   : > { %v1172_v12 = vpop.xlane.xlu0 %1171 }
 0x2f2   : > { %2047 = vmatprep.subr.mxu0 %v1172_v12 }
 0x2f3   : > { %2048 = vmatpush3.msra.mxu0 %v1172_v12 }
 0x2f4   : > { %2049 = vmatprep.subr.mxu0 %v1169_v18 }
 0x2f5   : > { %2050 = vmatpush3.msra.mxu0 %v1169_v18  ;;  %v1166_v58 = vpop.xlane.xlu0 %1165 }
 0x2f6   : > { %2051 = vmatprep.subr.mxu0 %v1166_v58 }
 0x2f7   : > { %2052 = vmatpush3.msra.mxu0 %v1166_v58 }
 0x2f9   : > { %v1163_v11 = vpop.xlane.xlu0 %1162 }
 0x2fa   : > { %2053 = vmatprep.subr.mxu0 %v1163_v11 }
 0x2fb   : > { %2054 = vmatpush3.msra.mxu0 %v1163_v11 }
 0x2fc   : > { %2056 = vmatmul.mubr.msk.f32.vlgmr.msra.gmra.mxu0 %vm1173_vm5, %v3406_v24 }
 0x2fd   : > { %2058 = vmatprep.mubr.msk.f32.mxu0 %vm1173_vm5, %v3408_v61 }
 0x2fe   : > { %v1540_v13 = vpop.xlane.xlu0 %1539 }
 0x300   : > { %2059 = vmatmul.mubr.msk.f32.gmra.mxu0 %vm1173_vm5, %v3414_v27 }
 0x301   : > { %2083 = vmatprep.mubr.msk.f32.mxu0 %vm1173_vm5, %v3400_v56 }
 0x302   : > { %v1543_v14 = vpop.xlane.xlu1 %1542  ;;  %v1534_v15 = vpop.xlane.xlu0 %1533 }
 0x303   : > { %2075 = vmatprep.subr.mxu0 %v1543_v14 }
 0x304   : > { %2076 = vmatpush3.msra.mxu0 %v1543_v14 }
 0x305   : > { %2077 = vmatprep.subr.mxu0 %v1540_v13 }
 0x306   : > { %v1537_v22 = vpop.xlane.xlu1 %1536  ;;  %2078 = vmatpush3.msra.mxu0 %v1540_v13 }
 0x307   : > { %2079 = vmatprep.subr.mxu0 %v1537_v22 }
 0x308   : > { %2080 = vmatpush3.msra.mxu0 %v1537_v22  ;;  %v1142_v22 = vld [vmem:[%s3677_s5 + $0x8] sm:$0xff] }
 0x309   : > { %2081 = vmatprep.subr.mxu0 %v1534_v15 }
 0x30a   : > { %2082 = vmatpush3.msra.mxu0 %v1534_v15  ;;  %v1137_v15 = vld [vmem:[%s3676_s4] sm:$0xff] }
 0x30b   : > { %2084 = vmatmul.mubr.msk.f32.vlgmr.msra.gmra.mxu0 %vm1173_vm5, %v3406_v24 }
 0x30c   : > { %2086 = vmatprep.mubr.msk.f32.mxu0 %vm1173_vm5, %v3408_v61 }
 0x30f   : > { %2087 = vmatmul.mubr.msk.f32.gmra.mxu0 %vm1173_vm5, %v3414_v27 }
 0x3bc   : > { %v2057_v20 = vpop.f32.mrf.mxu0 }
 0x3be   : > { %v1252_v3 = vpop.f32.mrf.mxu0 }
 0x3c0   : > { %v2060_v0 = vpop.f32.mrf.mxu0 }
 0x3c1   : > { %1288 = vperm.xlu1 %2212, %v2060_v0   ;;  %v1141_v0 = vld [vmem:[%s3677_s5] sm:$0xff] }
 0x3c2   : > { %v1262_v26 = vpop.f32.mrf.mxu0 }
 0x3c3   : > { %1283 = vperm.xlu0 %2213, %v1262_v26   ;;  %v1143_v26 = vld [vmem:[%s3677_s5 + $0x10] sm:$0xff] }
 0x3c5   : > { %1278 = vperm.xlu1 %2212, %v2057_v20   ;;  %v1144_v20 = vld [vmem:[%s3677_s5 + $0x18] sm:$0xff] }
 0x3c9   : > { %1273 = vperm.xlu1 %2212, %v1252_v3   ;;  %v1139_v3 = vld [vmem:[%s3676_s4 + $0x10] sm:$0xff] }
 0x3cb   : > { %v2085_v8 = vpop.f32.mrf.mxu0 }
 0x3cd   : > { %v1610_v10 = vpop.f32.mrf.mxu0  ;;  %1636 = vperm.xlu1 %2212, %v2085_v8  }
 0x3cf   : > { %v2088_v63 = vpop.f32.mrf.mxu0 }
 0x3d1   : > { %1646 = vperm.xlu1 %2212, %v2088_v63   ;;  %v1620_v28 = vpop.f32.mrf.mxu0 }
 0x3d5   : > { %1641 = vperm.xlu1 %2212, %v1620_v28  }
 0x3d9   : > { %1631 = vperm.xlu1 %2212, %v1610_v10  }
 0x43c   : > { %v1289_v2 = vpop.permute.xlu1 %1288 }
 0x43d   : > { %v3427_v19 = vsub.f32 %v3349_v59, %v1289_v2  ;;  %v3430_v30 = vsub.f32 %v3351_v47, %v1289_v2 }
 0x43e   : > { %v1284_v23 = vpop.permute.xlu0 %1283 }
 0x43f   : > { %v1305_v54 = vmul.f32 %v3427_v19, %v3427_v19  ;;  %v1306_v32 = vmul.f32 %v3430_v30, %v3430_v30  ;;  %v3437_v17 = vsub.f32 %v3334_v31, %v1284_v23  ;;  %v3440_v51 = vsub.f32 %v3336_v29, %v1284_v23 }
 0x440   : > { %v1279_v1 = vpop.permute.xlu1 %1278 }
 0x441   : > { %v1303_v33 = vmul.f32 %v3437_v17, %v3437_v17  ;;  %v1304_v59 = vmul.f32 %v3440_v51, %v3440_v51  ;;  %v3447_v47 = vsub.f32 %v3363_v41, %v1279_v1  ;;  %v3450_v44 = vsub.f32 %v3356_v21, %v1279_v1 }
 0x442   : > { %v1316_v38 = vadd.f32 %v1306_v32, %v1305_v54 }
 0x443   : > { %v1301_v31 = vmul.f32 %v3447_v47, %v3447_v47  ;;  %v1302_v29 = vmul.f32 %v3450_v44, %v3450_v44  ;;  %v1313_v37 = vadd.f32 %v1304_v59, %v1303_v33 }
 0x444   : > { %1317 = vadd.xlane.f32.xlu1 %v1316_v38  ;;  %v1274_v39 = vpop.permute.xlu1 %1273 }
 0x445   : > { %v3457_v40 = vsub.f32 %v3372_v60, %v1274_v39  ;;  %v3460_v34 = vsub.f32 %v3368_v45, %v1274_v39  ;;  %1314 = vadd.xlane.f32.xlu0 %v1313_v37  ;;  %v1310_v41 = vadd.f32 %v1302_v29, %v1301_v31 }
 0x447   : > { %v1299_v21 = vmul.f32 %v3457_v40, %v3457_v40  ;;  %v1300_v43 = vmul.f32 %v3460_v34, %v3460_v34 }
 0x448   : > { %1311 = vadd.xlane.f32.xlu1 %v1310_v41  ;;  %v1637_v25 = vpop.permute.xlu1 %1636 }
 0x449   : > { %v1307_v57 = vadd.f32 %v1300_v43, %v1299_v21  ;;  %v3467_v7 = vsub.f32 %v3396_v48, %v1637_v25  ;;  %v3470_v4 = vsub.f32 %v3392_v49, %v1637_v25 }
 0x44b   : > { %1308 = vadd.xlane.f32.xlu0 %v1307_v57  ;;  %v1659_v5 = vmul.f32 %v3467_v7, %v3467_v7  ;;  %v1660_v49 = vmul.f32 %v3470_v4, %v3470_v4 }
 0x44c   : > { %v1647_v60 = vpop.permute.xlu1 %1646 }
 0x44d   : > { %v3473_v45 = vsub.f32 %v3386_v6, %v1647_v60  ;;  %v3476_v9 = vsub.f32 %v3388_v46, %v1647_v60 }
 0x44f   : > { %v1663_v52 = vmul.f32 %v3473_v45, %v3473_v45  ;;  %v1664_v50 = vmul.f32 %v3476_v9, %v3476_v9 }
 0x450   : > { %v1642_v53 = vpop.permute.xlu1 %1641 }
 0x451   : > { %v3487_v16 = vsub.f32 %v3376_v42, %v1642_v53  ;;  %v3490_v6 = vsub.f32 %v3378_v62, %v1642_v53  ;;  %v1674_v46 = vadd.f32 %v1664_v50, %v1663_v52  ;;  %v1668_v42 = vadd.f32 %v1660_v49, %v1659_v5 }
 0x453   : > { %v1661_v48 = vmul.f32 %v3487_v16, %v3487_v16  ;;  %v1662_v55 = vmul.f32 %v3490_v6, %v3490_v6  ;;  %1675 = vadd.xlane.f32.xlu1 %v1674_v46 }
 0x454   : > { %v1632_v12 = vpop.permute.xlu1 %1631 }
 0x455   : > { %v3497_v18 = vsub.f32 %v3380_v36, %v1632_v12  ;;  %v3500_v58 = vsub.f32 %v3382_v35, %v1632_v12  ;;  %v1671_v11 = vadd.f32 %v1662_v55, %v1661_v48  ;;  %v1138_v36 = vld [vmem:[%s3676_s4 + $0x8] sm:$0xff]  ;;  %v1140_v35 = vld [vmem:[%s3676_s4 + $0x18] sm:$0xff] }
 0x457   : > { %v1657_v62 = vmul.f32 %v3497_v18, %v3497_v18  ;;  %v1658_v13 = vmul.f32 %v3500_v58, %v3500_v58  ;;  %1669 = vadd.xlane.f32.xlu1 %v1668_v42  ;;  %1672 = vadd.xlane.f32.xlu0 %v1671_v11 }
 0x459   : > { %v1665_v14 = vadd.f32 %v1658_v13, %v1657_v62 }
 0x45b   : > { %1666 = vadd.xlane.f32.xlu0 %v1665_v14 }
 0x468   : > { %1443 = vperm.xlu1 %2212, %v1138_v36  }
 0x46c   : > { %1453 = vperm.xlu1 %2212, %v1140_v35  }
 0x470   : > { %1471 = vperm.xlu1 %2212, %v1142_v22  }
 0x471   : > { %1438 = vperm.xlu0 %2213, %v1137_v15  }
 0x474   : > { %1481 = vperm.xlu1 %2212, %v1144_v20  }
 0x475   : > { %1448 = vperm.xlu0 %2213, %v1139_v3  }
 0x479   : > { %1466 = vperm.xlu0 %2213, %v1141_v0  }
 0x47d   : > { %1476 = vperm.xlu0 %2213, %v1143_v26  }
 0x4cd   : > { %v1318_v8 = vpop.xlane.xlu1 %1317 }
 0x4ce   : > { %2061 = vmatprep.subr.mxu1 %v1318_v8  ;;  %v1315_v10 = vpop.xlane.xlu0 %1314 }
 0x4cf   : > { %2062 = vmatpush3.msra.mxu1 %v1318_v8 }
 0x4d0   : > { %2063 = vmatprep.subr.mxu1 %v1315_v10 }
 0x4d1   : > { %v1312_v63 = vpop.xlane.xlu1 %1311  ;;  %2064 = vmatpush3.msra.mxu1 %v1315_v10 }
 0x4d2   : > { %2065 = vmatprep.subr.mxu1 %v1312_v63 }
 0x4d3   : > { %2066 = vmatpush3.msra.mxu1 %v1312_v63 }
 0x4d4   : > { %v1309_v28 = vpop.xlane.xlu0 %1308 }
 0x4d5   : > { %2067 = vmatprep.subr.mxu1 %v1309_v28 }
 0x4d6   : > { %2068 = vmatpush3.msra.mxu1 %v1309_v28 }
 0x4d7   : > { %2070 = vmatmul.mubr.msk.f32.vlgmr.msra.gmra.mxu1 %vm1173_vm5, %v3406_v24 }
 0x4d8   : > { %2072 = vmatprep.mubr.msk.f32.mxu1 %vm1173_vm5, %v3408_v61 }
 0x4db   : > { %2073 = vmatmul.mubr.msk.f32.gmra.mxu1 %vm1173_vm5, %v3414_v27 }
 0x4dc   : > { %v1676_v2 = vpop.xlane.xlu1 %1675  ;;  %2097 = vmatprep.mubr.msk.f32.mxu1 %vm1173_vm5, %v3400_v56 }
 0x4dd   : > { %2089 = vmatprep.subr.mxu1 %v1676_v2 }
 0x4de   : > { %2090 = vmatpush3.msra.mxu1 %v1676_v2 }
 0x4e0   : > { %v1673_v23 = vpop.xlane.xlu0 %1672  ;;  %v1670_v54 = vpop.xlane.xlu1 %1669 }
 0x4e1   : > { %2091 = vmatprep.subr.mxu1 %v1673_v23 }
 0x4e2   : > { %2092 = vmatpush3.msra.mxu1 %v1673_v23 }
 0x4e3   : > { %2093 = vmatprep.subr.mxu1 %v1670_v54 }
 0x4e4   : > { %2094 = vmatpush3.msra.mxu1 %v1670_v54  ;;  %v1667_v32 = vpop.xlane.xlu0 %1666  ;;  %v3546_v55 = vpop.permute.xlu1 %1443 }
 0x4e5   : > { %2095 = vmatprep.subr.mxu1 %v1667_v32 }
 0x4e6   : > { %2096 = vmatpush3.msra.mxu1 %v1667_v32 }
 0x4e7   : > { %2098 = vmatmul.mubr.msk.f32.vlgmr.msra.gmra.mxu1 %vm1173_vm5, %v3406_v24 }
 0x4e8   : > { %2100 = vmatprep.mubr.msk.f32.mxu1 %vm1173_vm5, %v3408_v61  ;;  %v3550_v42 = vpop.permute.xlu1 %1453 }
 0x4eb   : > { %2101 = vmatmul.mubr.msk.f32.gmra.mxu1 %vm1173_vm5, %v3414_v27 }
 0x4ec   : > { %v3544_v48 = vpop.permute.xlu0 %1438  ;;  %v3554_v62 = vpop.permute.xlu1 %1471 }
 0x4f0   : > { %v3548_v12 = vpop.permute.xlu0 %1448  ;;  %v3558_v14 = vpop.permute.xlu1 %1481 }
 0x4f4   : > { %v3552_v11 = vpop.permute.xlu0 %1466 }
 0x4f8   : > { %v3556_v13 = vpop.permute.xlu0 %1476 }
 0x597   : > { %v2071_v56 = vpop.f32.mrf.mxu1 }
 0x598   : > { %v1391_v1 = vadd.f32 1e-05, %v2071_v56 }
 0x599   : > { %v1385_v33 = vpop.f32.mrf.mxu1 }
 0x59a   : > { %2218 = vrsqrt.f32 %v1391_v1  ;;  %v1386_v59 = vadd.f32 1e-05, %v1385_v33 }
 0x59b   : > { %v2074_v38 = vpop.f32.mrf.mxu1 }
 0x59c   : > { %2220 = vrsqrt.f32 %v1386_v59  ;;  %v1401_v31 = vadd.f32 1e-05, %v2074_v38 }
 0x59d   : > { %v1395_v29 = vpop.f32.mrf.mxu1 }
 0x59e   : > { %2222 = vrsqrt.f32 %v1401_v31  ;;  %v1396_v37 = vadd.f32 1e-05, %v1395_v29 }
 0x5a0   : > { %2224 = vrsqrt.f32 %v1396_v37 }
 0x5a7   : > { %v2219_v39 = vpop.eup %2218  ;;  %v2099_v24 = vpop.f32.mrf.mxu1 }
 0x5a8   : > { %v1749_v41 = vadd.f32 1e-05, %v2099_v24  ;;  %1415 = vperm.xlu0 %2213, %v2219_v39  }
 0x5a9   : > { %v2221_v61 = vpop.eup %2220  ;;  %v1743_v21 = vpop.f32.mrf.mxu1 }
 0x5aa   : > { %2226 = vrsqrt.f32 %v1749_v41  ;;  %v1744_v27 = vadd.f32 1e-05, %v1743_v21  ;;  %1410 = vperm.xlu1 %2212, %v2221_v61  }
 0x5ab   : > { %v2223_v43 = vpop.eup %2222  ;;  %v2102_v25 = vpop.f32.mrf.mxu1 }
 0x5ac   : > { %2228 = vrsqrt.f32 %v1744_v27  ;;  %v1759_v57 = vadd.f32 1e-05, %v2102_v25 }
 0x5ad   : > { %v1753_v60 = vpop.f32.mrf.mxu1  ;;  %v2225_v50 = vpop.eup %2224 }
 0x5ae   : > { %2230 = vrsqrt.f32 %v1759_v57  ;;  %v1754_v52 = vadd.f32 1e-05, %v1753_v60  ;;  %1425 = vperm.xlu1 %2212, %v2223_v43  }
 0x5b0   : > { %2232 = vrsqrt.f32 %v1754_v52 }
 0x5b2   : > { %1420 = vperm.xlu1 %2212, %v2225_v50  }
 0x5b7   : > { %v2227_v5 = vpop.eup %2226 }
 0x5b8   : > { %1773 = vperm.xlu1 %2212, %v2227_v5  }
 0x5b9   : > { %v2229_v53 = vpop.eup %2228 }
 0x5ba   : > { %1768 = vperm.xlu0 %2213, %v2229_v53  }
 0x5bb   : > { %v2231_v49 = vpop.eup %2230 }
 0x5bc   : > { %1783 = vperm.xlu1 %2212, %v2231_v49  }
 0x5bd   : > { %v2233_v46 = vpop.eup %2232 }
 0x5be   : > { %1778 = vperm.xlu0 %2213, %v2233_v46  }
 0x623   : > { %v1416_v36 = vpop.permute.xlu0 %1415 }
 0x624   : > { %v1430_v35 = vmul.f32 %v1416_v36, %v3447_v47  ;;  %v1431_v22 = vmul.f32 %v1416_v36, %v3450_v44 }
 0x625   : > { %v1411_v15 = vpop.permute.xlu1 %1410 }
 0x626   : > { %v1458_v20 = vmul.f32 %v3546_v55, %v1430_v35  ;;  %v1459_v3 = vmul.f32 %v3546_v55, %v1431_v22  ;;  %v1428_v0 = vmul.f32 %v1411_v15, %v3457_v40  ;;  %v1429_v26 = vmul.f32 %v1411_v15, %v3460_v34 }
 0x628   : > { %v1486_v8 = vadd.f32 %v3554_v62, %v1458_v20  ;;  %v1487_v10 = vadd.f32 %v3554_v62, %v1459_v3  ;;  %v1456_v63 = vmul.f32 %v3544_v48, %v1428_v0  ;;  %v1457_v28 = vmul.f32 %v3544_v48, %v1429_v26 }
 0x629   : > { %v1426_v47 = vpop.permute.xlu1 %1425 }
 0x62a   : > { %v1434_v44 = vmul.f32 %v1426_v47, %v3427_v19  ;;  %v1435_v2 = vmul.f32 %v1426_v47, %v3430_v30  ;;  %vm1494_vm12 = vcmp.ge.f32.partialorder %v1486_v8, 0.0  ;;  %vm1495_vm13 = vcmp.ge.f32.partialorder %v1487_v10, 0.0 }
 0x62b   : > { %v1502_v23 = vmul.f32 0.2, %v1486_v8  ;;  %v1503_v54 = vmul.f32 0.2, %v1487_v10  ;;  %v1484_v40 = vadd.f32 %v3552_v11, %v1456_v63  ;;  %v1485_v34 = vadd.f32 %v3552_v11, %v1457_v28 }
 0x62c   : > { %v1462_v56 = vmul.f32 %v3550_v42, %v1434_v44  ;;  %v1463_v1 = vmul.f32 %v3550_v42, %v1435_v2 }
 0x62d   : > { %v1421_v32 = vpop.permute.xlu1 %1420  ;;  %v1510_v29 = vsel %vm1494_vm12, %v1486_v8, %v1502_v23  ;;  %v1511_v37 = vsel %vm1495_vm13, %v1487_v10, %v1503_v54  ;;  %vm1492_vm14 = vcmp.ge.f32.partialorder %v1484_v40, 0.0  ;;  %vm1493_vm15 = vcmp.ge.f32.partialorder %v1485_v34, 0.0 }
 0x62e   : > { %v1432_v33 = vmul.f32 %v1421_v32, %v3437_v17  ;;  %v1433_v19 = vmul.f32 %v1421_v32, %v3440_v51  ;;  %v1490_v30 = vadd.f32 %v3558_v14, %v1462_v56  ;;  %v1491_v59 = vadd.f32 %v3558_v14, %v1463_v1 }
 0x62f   : > { %v1500_v17 = vmul.f32 0.2, %v1484_v40  ;;  %v1501_v41 = vmul.f32 0.2, %v1485_v34 }
 0x630   : > { %v1460_v38 = vmul.f32 %v3548_v12, %v1432_v33  ;;  %v1461_v31 = vmul.f32 %v3548_v12, %v1433_v19  ;;  %vm1498_vm0 = vcmp.ge.f32.partialorder %v1490_v30, 0.0  ;;  %vm1499_vm1 = vcmp.ge.f32.partialorder %v1491_v59, 0.0 }
 0x631   : > { %v1506_v39 = vmul.f32 0.2, %v1490_v30  ;;  %v1507_v24 = vmul.f32 0.2, %v1491_v59  ;;  %v1508_v36 = vsel %vm1492_vm14, %v1484_v40, %v1500_v17  ;;  %v1509_v35 = vsel %vm1493_vm15, %v1485_v34, %v1501_v41 }
 0x632   : > { %v1488_v51 = vadd.f32 %v3556_v13, %v1460_v38  ;;  %v1489_v61 = vadd.f32 %v3556_v13, %v1461_v31 }
 0x633   : > { %v1774_v21 = vpop.permute.xlu1 %1773  ;;  %v1514_v27 = vsel %vm1498_vm0, %v1490_v30, %v1506_v39  ;;  %v1515_v43 = vsel %vm1499_vm1, %v1491_v59, %v1507_v24 }
 0x634   : > { %v1788_v25 = vmul.f32 %v1774_v21, %v3467_v7  ;;  %v1789_v57 = vmul.f32 %v1774_v21, %v3470_v4  ;;  %v1518_v60 = vadd.f32 %v1514_v27, %v1510_v29  ;;  %v1519_v52 = vadd.f32 %v1515_v43, %v1511_v37 }
 0x635   : > { %vm1496_vm2 = vcmp.ge.f32.partialorder %v1488_v51, 0.0  ;;  %vm1497_vm3 = vcmp.ge.f32.partialorder %v1489_v61, 0.0  ;;  %v1769_v50 = vpop.permute.xlu0 %1768  ;;  %v1504_v5 = vmul.f32 0.2, %v1488_v51  ;;  %v1505_v53 = vmul.f32 0.2, %v1489_v61 }
 0x636   : > { %v1796_v49 = vmul.f32 %v1788_v25, %v3546_v55  ;;  %v1797_v46 = vmul.f32 %v1789_v57, %v3546_v55  ;;  %1522 = vst [vmem:[%s3591_s19 + $0x10] sm:$0xff] %v1518_v60  ;;  %1523 = vst [vmem:[%s3591_s19 + $0x18] sm:$0xff] %v1519_v52  ;;  %v1786_v7 = vmul.f32 %v1769_v50, %v3497_v18 }
 0x637   : > { %v1787_v4 = vmul.f32 %v1769_v50, %v3500_v58  ;;  %v1512_v22 = vsel %vm1496_vm2, %v1488_v51, %v1504_v5  ;;  %v1513_v15 = vsel %vm1497_vm3, %v1489_v61, %v1505_v53  ;;  %v1784_v3 = vpop.permute.xlu1 %1783 }
 0x638   : > { %v1804_v55 = vadd.f32 %v1796_v49, %v3554_v62  ;;  %v1805_v20 = vadd.f32 %v1797_v46, %v3554_v62  ;;  %v1516_v0 = vadd.f32 %v1512_v22, %v1508_v36  ;;  %v1517_v26 = vadd.f32 %v1513_v15, %v1509_v35 }
 0x639   : > { %v1794_v8 = vmul.f32 %v1786_v7, %v3544_v48  ;;  %v1795_v10 = vmul.f32 %v1787_v4, %v3544_v48  ;;  %v1779_v63 = vpop.permute.xlu0 %1778  ;;  %v1792_v28 = vmul.f32 %v1784_v3, %v3473_v45  ;;  %v1793_v47 = vmul.f32 %v1784_v3, %v3476_v9 }
 0x63a   : > { %1520 = vst [vmem:[%s3591_s19] sm:$0xff] %v1516_v0  ;;  %1521 = vst [vmem:[%s3591_s19 + $0x8] sm:$0xff] %v1517_v26  ;;  %v1790_v62 = vmul.f32 %v1779_v63, %v3487_v16  ;;  %v1791_v44 = vmul.f32 %v1779_v63, %v3490_v6  ;;  %vm1812_vm4 = vcmp.ge.f32.partialorder %v1804_v55, 0.0  ;;  %vm1813_vm6 = vcmp.ge.f32.partialorder %v1805_v20, 0.0 }
 0x63b   : > { %v1802_v18 = vadd.f32 %v1794_v8, %v3552_v11  ;;  %v1803_v58 = vadd.f32 %v1795_v10, %v3552_v11  ;;  %v1820_v2 = vmul.f32 0.2, %v1804_v55  ;;  %v1821_v48 = vmul.f32 0.2, %v1805_v20 }
 0x63c   : > { %v1800_v23 = vmul.f32 %v1792_v28, %v3550_v42  ;;  %v1801_v54 = vmul.f32 %v1793_v47, %v3550_v42  ;;  %v1798_v11 = vmul.f32 %v1790_v62, %v3548_v12  ;;  %v1799_v45 = vmul.f32 %v1791_v44, %v3548_v12 }
 0x63d   : > { %v1818_v40 = vmul.f32 0.2, %v1802_v18  ;;  %v1819_v9 = vmul.f32 0.2, %v1803_v58  ;;  %v1828_v56 = vsel %vm1812_vm4, %v1804_v55, %v1820_v2  ;;  %v1829_v1 = vsel %vm1813_vm6, %v1805_v20, %v1821_v48 }
 0x63e   : > { %v1808_v16 = vadd.f32 %v1800_v23, %v3558_v14  ;;  %v1809_v6 = vadd.f32 %v1801_v54, %v3558_v14  ;;  %v1806_v34 = vadd.f32 %v1798_v11, %v3556_v13  ;;  %v1807_v32 = vadd.f32 %v1799_v45, %v3556_v13 }
 0x63f   : > { %vm1810_vm7 = vcmp.ge.f32.partialorder %v1802_v18, 0.0  ;;  %vm1811_vm8 = vcmp.ge.f32.partialorder %v1803_v58, 0.0 }
 0x640   : > { %vm1816_vm9 = vcmp.ge.f32.partialorder %v1808_v16, 0.0  ;;  %vm1817_vm10 = vcmp.ge.f32.partialorder %v1809_v6, 0.0  ;;  %v1824_v42 = vmul.f32 0.2, %v1808_v16  ;;  %v1825_v12 = vmul.f32 0.2, %v1809_v6 }
 0x641   : > { %vm1814_vm11 = vcmp.ge.f32.partialorder %v1806_v34, 0.0  ;;  %vm1815_vm5 = vcmp.ge.f32.partialorder %v1807_v32, 0.0  ;;  %v1822_v33 = vmul.f32 0.2, %v1806_v34  ;;  %v1823_v14 = vmul.f32 0.2, %v1807_v32 }
 0x642   : > { %v1826_v19 = vsel %vm1810_vm7, %v1802_v18, %v1818_v40  ;;  %v1827_v13 = vsel %vm1811_vm8, %v1803_v58, %v1819_v9  ;;  %v1832_v30 = vsel %vm1816_vm9, %v1808_v16, %v1824_v42  ;;  %v1833_v59 = vsel %vm1817_vm10, %v1809_v6, %v1825_v12 }
 0x643   : > { %v1836_v38 = vadd.f32 %v1832_v30, %v1828_v56  ;;  %v1837_v31 = vadd.f32 %v1833_v59, %v1829_v1  ;;  %v1830_v29 = vsel %vm1814_vm11, %v1806_v34, %v1822_v33  ;;  %v1831_v37 = vsel %vm1815_vm5, %v1807_v32, %v1823_v14 }
 0x644   : > { %v1834_v39 = vadd.f32 %v1830_v29, %v1826_v19  ;;  %v1835_v24 = vadd.f32 %v1831_v37, %v1827_v13 }
 0x645   : > { %2003 = vst [vmem:[%s3591_s19 + $0x30] sm:$0xff] %v1836_v38  ;;  %2004 = vst [vmem:[%s3591_s19 + $0x38] sm:$0xff] %v1837_v31 }
 0x646   : > { %2001 = vst [vmem:[%s3591_s19 + $0x20] sm:$0xff] %v1834_v39  ;;  %2002 = vst [vmem:[%s3591_s19 + $0x28] sm:$0xff] %v1835_v24 }
 0x647   : > { %2353 = shalt.err (!%p2350_p9)
}
 0x648   : > { %s2354_s9 = scalar_lea.hbm %s3622_s23, 1024  ;;  %s2358_s19 = scalar_lea.hbm %s3679_s7, 2048 }
 0x649   : > { %p2355_p7 = scmp.ne.s32.totalorder %s3622_s23, %s2354_s9  ;;  %p2359_p2 = scmp.lt.s32.totalorder %s3622_s23, %s3679_s7 }
 0x64a   : > { %p2360_p11 = scmp.lt.s32.totalorder %s2358_s19, %s2354_s9 }
 0x64b   : > { %p2356_p4 = pnand %p2355_p7, %p3703_p0 }
 0x64c   : > { %p2361_p13 = por %p2360_p11, %p2359_p2 }
 0x64d   : > { %p2357_p8 = pneg %p2356_p4 }
 0x64f   : > { %p2362_p12 = pnand %p2361_p13, %p2357_p8 }
 0x651   : > { %2365 = shalt.err (!%p2362_p12)
}
 0x652   : > { %s2450_s22 = smov 256  }
 0x653   : > { %2117 = dma.vmem_to_hbm [thread:$0]  (%p3703_p0), %s3624_s16, 1024, %s3622_s23, %s1844_s15, %s2450_s22, %s2450_s22, %s2441_s17  }
 0x654 PF: > { %s1873_s10 = sand.u32 1, %s2400_s24   ;;  %p3704_p5 = scmp.ne.s32.totalorder %s3688_s8, 0 }
 0x655   : > { %p3705_p10 = scmp.ge.s32.totalorder %s2412_s27, 2  ;;  %s1874_s1 = scalar_lea.sflag [#allocation4], %s1873_s10 }
 0x657   : > { %p2134_p1 = pnand %p3705_p10, %p3704_p5 }
 0x659   : > { %p2135_p3 = pneg %p2134_p1 }
 0x65b   : > { %2395 = dma.done.wait (%p2135_p3), %s1874_s1, 1024  }
 0x65c   : > { %2397 = vsyncadd (%p2135_p3), %s1874_s1, 4294966272  ;;  %p22_p6 = scmp.ge.s32.totalorder %s2574_s18, 4   ;;  %s3706_s24 = smov %s2404_s25 }
 0x65d   : > { %s3707_s25 = smov %s2408_s26  ;;  %s3708_s26 = smov %s2584_s21 }
 0x65e   : > { %s3709_s27 = smov %s2574_s18  ;;  %24 = sbr.rel (!%p22_p6) target bundleno = 9 (0x9), region = 107 }
 0x663   :  { %1879 = vsyncpa [#allocation3], 1 }
 0x664   :  { %1881 = vsyncpa [#allocation3 + $0x1], 1 }
 0x665   :  { %1882 = vsyncpa [#allocation6], 1 }
 0x666   :  { %1883 = vsyncpa [#allocation9], 1 }
 0x667   :  { %1884 = vsyncpa [#allocation4], 1 }
 0x668   :  { %1886 = vsyncpa [#allocation4 + $0x1], 1 }

</bundles_post_ra>
